<compile_context>
chip_gen: v7x
topology: tpu7x:2x2x1
jax: 0.10.0
libtpu: 0.0.40
codegen_flags: <defaults>
</compile_context>

<pallas_src>
import jax
import jax.numpy as jnp
from jax.experimental import pallas as pl
from jax.experimental.pallas import tpu as pltpu

H1_PAD = 512        # hidden 400 padded up to a multiple of 128
_MAX_TILE_B = 2048  # keeps per-tile f32 intermediates (<= 4 MiB) inside v5e's 16 MiB scoped VMEM


def _round_up(x, m):
    return ((x + m - 1) // m) * m


def _pick_tile_b(batch, requested=None):
    """Batch tile (lane dim): multiple of 128, >=2 tiles when possible, capped."""
    b128 = _round_up(max(int(batch), 1), 128)
    if requested is not None:
        t = _round_up(max(int(requested), 1), 128)
    else:
        t = b128 if b128 <= 128 else min(_MAX_TILE_B, _round_up(b128 // 2, 128))
    return min(t, b128)


def cnet_kernel(sT_ref, aT_ref, wsT_ref, waT_ref, bsa_ref, w12_ref, b12_ref,
                out_ref):
    # First (fused fcs/fca) layer, transposed: xT = Ws^T s^T + Wa^T a^T + bsa
    # MXU matmuls, f32 accumulation; inputs/weights are bf16.
    xT = jnp.dot(wsT_ref[...], sT_ref[...],
                 preferred_element_type=jnp.float32)            # (512, tile_b)
    xT = xT + jnp.dot(waT_ref[...], aT_ref[...],
                      preferred_element_type=jnp.float32)
    netT = jnp.maximum(xT + bsa_ref[...], 0.0)                  # f32 ReLU on VPU

    # Folded out1∘out2: q = sum_h net[h] * w12[h] + b12  (VPU mul + sublane reduce).
    q_row = jnp.sum(netT * w12_ref[...], axis=0, keepdims=True) + b12_ref[...]
    out_ref[...] = q_row                                        # (1, tile_b) lane-dense


def cnet_forward(s, a, prepped, *, tile_b=None):
    """Fused/padded CNet forward. Returns q of shape (B, 1), float32."""
    B = s.shape[0]
    t = _pick_tile_b(B, tile_b)
    n_tiles = -(-B // t)
    b_pad = n_tiles * t

    # Pad batch, transpose (batch -> lanes) and cast to bf16 in one XLA op each.
    sT = jnp.pad(s.astype(jnp.float32), ((0, b_pad - B), (0, 0))).T.astype(jnp.bfloat16)
    aT = jnp.pad(a.astype(jnp.float32), ((0, b_pad - B), (0, 0))).T.astype(jnp.bfloat16)
    s_dim, a_dim = sT.shape[0], aT.shape[0]

    const = lambda i: (0, 0)  # weights/biases: same block every grid step (VMEM-resident)
    out = pl.pallas_call(
        cnet_kernel,
        out_shape=jax.ShapeDtypeStruct((n_tiles, t), jnp.float32),
        grid=(n_tiles,),
        in_specs=[
            pl.BlockSpec((s_dim, t), lambda i: (0, i)),   # s^T  (batch-tiled, bf16)
            pl.BlockSpec((a_dim, t), lambda i: (0, i)),   # a^T  (batch-tiled, bf16)
            pl.BlockSpec((H1_PAD, s_dim), const),         # Ws^T (bf16)
            pl.BlockSpec((H1_PAD, a_dim), const),         # Wa^T (bf16)
            pl.BlockSpec((H1_PAD, 1), const),             # bs + ba  (f32 column)
            pl.BlockSpec((H1_PAD, 1), const),             # W1 @ W2  (f32 column)
            pl.BlockSpec((1, 1), const),                  # b1 @ W2 + b2 (f32)
        ],
        out_specs=pl.BlockSpec((1, t), lambda i: (i, 0)),
        compiler_params=pltpu.CompilerParams(
            dimension_semantics=("parallel",)),           # v7x: shard tiles over both TCs
    )(sT, aT, prepped["wsT"], prepped["waT"], prepped["bsa"],
      prepped["w12"], prepped["b12"])

    return out.reshape(b_pad, 1)[:B]


def init_params(key, s_dim, a_dim):
    """Logical (unpadded) params mirroring the PyTorch module.

    Weights ~ N(0, 0.1) (as in the reference __init__); biases use the
    PyTorch-Linear default uniform(-1/sqrt(fan_in), 1/sqrt(fan_in)).
    Weights stored transposed: (in_features, out_features).
    """
    ks = jax.random.split(key, 8)

    def w(k, fan_in, fan_out):
        return (0.1 * jax.random.normal(k, (fan_in, fan_out))).astype(jnp.float32)

    def b(k, fan_in, fan_out):
        bound = 1.0 / jnp.sqrt(jnp.float32(fan_in))
        return jax.random.uniform(k, (1, fan_out), jnp.float32, -bound, bound)

    return {
        "ws": w(ks[0], s_dim, 400), "bs": b(ks[1], s_dim, 400),
        "wa": w(ks[2], a_dim, 400), "ba": b(ks[3], a_dim, 400),
        "w1": w(ks[4], 400, 300),   "b1": b(ks[5], 400, 300),
        "w2": w(ks[6], 300, 1),     "b2": b(ks[7], 300, 1),
    }


def prepare_params(p, dtype=jnp.bfloat16):
    """One-time prep: transpose+pad layer-1 weights, fuse fcs/fca biases, and
    fold out1 into out2 in f32 (exact — there is no activation between them)."""
    h1 = p["ws"].shape[1]                      # 400
    pad = H1_PAD - h1

    wsT = jnp.pad(p["ws"].T, ((0, pad), (0, 0))).astype(dtype)        # (512, s_dim)
    waT = jnp.pad(p["wa"].T, ((0, pad), (0, 0))).astype(dtype)        # (512, a_dim)
    bsa = jnp.pad((p["bs"] + p["ba"]).T, ((0, pad), (0, 0))).astype(jnp.float32)  # (512, 1)

    w12 = (p["w1"] @ p["w2"]).astype(jnp.float32)                     # (400, 1)
    w12 = jnp.pad(w12, ((0, pad), (0, 0)))                            # (512, 1) f32
    b12 = (p["b1"] @ p["w2"] + p["b2"]).reshape(1, 1).astype(jnp.float32)

    return {"wsT": wsT, "waT": waT, "bsa": bsa, "w12": w12, "b12": b12}


def cnet_reference_f32(s, a, p):
    """Full-precision reference (exact PyTorch forward semantics)."""
    x = s @ p["ws"] + p["bs"]
    y = a @ p["wa"] + p["ba"]
    net = jnp.maximum(x + y, 0.0)
    h = net @ p["w1"] + p["b1"]
    return h @ p["w2"] + p["b2"]


def cnet_reference_policy(s, a, prepped):
    """Reference mirroring the kernel's dtype policy (bf16 layer-1, f32 rest)."""
    x = jnp.dot(s.astype(jnp.bfloat16), prepped["wsT"].T,
                preferred_element_type=jnp.float32)
    y = jnp.dot(a.astype(jnp.bfloat16), prepped["waT"].T,
                preferred_element_type=jnp.float32)
    net = jnp.maximum(x + y + prepped["bsa"].T, 0.0)                  # (B, 512) f32
    return net @ prepped["w12"] + prepped["b12"]                      # (B, 1)  f32


if __name__ == "__main__":
    key = jax.random.PRNGKey(0)
    k_s, k_a, k_p, k_s2, k_a2 = jax.random.split(key, 5)

    s_dim, a_dim = 16, 4
    params = init_params(k_p, s_dim, a_dim)
    prepped = prepare_params(params)

    # --- small shape consistent with the module (batch=2, single tile) ---
    B = 2
    s = jax.random.normal(k_s, (B, s_dim), jnp.float32)
    a = jax.random.normal(k_a, (B, a_dim), jnp.float32)

    q = cnet_forward(s, a, prepped)
    jax.block_until_ready(q)
    assert q.shape == (B, 1)
    assert jnp.allclose(q, cnet_reference_policy(s, a, prepped), atol=2e-3, rtol=2e-3)
    assert jnp.allclose(q, cnet_reference_f32(s, a, params), atol=5e-2, rtol=5e-2)

    # --- exercise the batch grid: default tile picker (>=2 tiles) ---
    B2 = 300
    s2 = jax.random.normal(k_s2, (B2, s_dim), jnp.float32)
    a2 = jax.random.normal(k_a2, (B2, a_dim), jnp.float32)
    q2 = cnet_forward(s2, a2, prepped)
    jax.block_until_ready(q2)
    assert q2.shape == (B2, 1)
    assert jnp.allclose(q2, cnet_reference_policy(s2, a2, prepped), atol=2e-3, rtol=2e-3)
    assert jnp.allclose(q2, cnet_reference_f32(s2, a2, params), atol=5e-2, rtol=5e-2)

    # --- robustness: odd user tile_b is coerced to a lane multiple (128) ---
    q3 = cnet_forward(s2, a2, prepped, tile_b=100)
    jax.block_until_ready(q3)
    assert q3.shape == (B2, 1)
    assert jnp.allclose(q3, cnet_reference_policy(s2, a2, prepped), atol=2e-3, rtol=2e-3)

    print("KERNEL_OK")
</pallas_src>

<mosaic_0001>
module attributes {stable_mosaic.version = 11 : i64} {
  func.func @cnet_kernel(%arg0: i32, %arg1: memref<16x128xbf16, #tpu.memory_space<vmem>>, %arg2: memref<4x128xbf16, #tpu.memory_space<vmem>>, %arg3: memref<512x16xbf16, #tpu.memory_space<vmem>>, %arg4: memref<512x4xbf16, #tpu.memory_space<vmem>>, %arg5: memref<512x1xf32, #tpu.memory_space<vmem>>, %arg6: memref<512x1xf32, #tpu.memory_space<vmem>>, %arg7: memref<1x1xf32, #tpu.memory_space<vmem>>, %arg8: memref<1x128xf32, #tpu.memory_space<vmem>>) attributes {dimension_semantics = [#tpu.dimension_semantics<parallel>], iteration_bounds = array<i64: 1>, scalar_prefetch = 0 : i64, scratch_operands = 0 : i64, tpu.core_type = #tpu.core_type<tc>, window_params = [{transform_indices = @transform_0, window_bounds = array<i64: 16, 128>}, {transform_indices = @transform_1, window_bounds = array<i64: 4, 128>}, {pipeline_mode = #tpu.pipeline_mode<synchronous>, transform_indices = @transform_2, window_bounds = array<i64: 512, 16>}, {pipeline_mode = #tpu.pipeline_mode<synchronous>, transform_indices = @transform_3, window_bounds = array<i64: 512, 4>}, {pipeline_mode = #tpu.pipeline_mode<synchronous>, transform_indices = @transform_4, window_bounds = array<i64: 512, 1>}, {pipeline_mode = #tpu.pipeline_mode<synchronous>, transform_indices = @transform_5, window_bounds = array<i64: 512, 1>}, {pipeline_mode = #tpu.pipeline_mode<synchronous>, transform_indices = @transform_6, window_bounds = array<i64: 1, 1>}, {transform_indices = @transform_7, window_bounds = array<i64: 1, 128>}]} {
    %c0 = arith.constant 0 : index
    %c0_0 = arith.constant 0 : index
    %0 = vector.load %arg3[%c0, %c0_0] : memref<512x16xbf16, #tpu.memory_space<vmem>>, vector<512x16xbf16>
    %c0_1 = arith.constant 0 : index
    %c0_2 = arith.constant 0 : index
    %1 = vector.load %arg1[%c0_1, %c0_2] : memref<16x128xbf16, #tpu.memory_space<vmem>>, vector<16x128xbf16>
    %cst = arith.constant dense<0.000000e+00> : vector<512x128xf32>
    %2 = tpu.matmul %0, %1, %cst {dimension_numbers = #tpu.dot_dimension_numbers<[1], [0], [0], [1], [0, 0, 1, 1], [], []>} : vector<512x16xbf16>, vector<16x128xbf16>, vector<512x128xf32> -> vector<512x128xf32>
    %c0_3 = arith.constant 0 : index
    %c0_4 = arith.constant 0 : index
    %3 = vector.load %arg4[%c0_3, %c0_4] : memref<512x4xbf16, #tpu.memory_space<vmem>>, vector<512x4xbf16>
    %c0_5 = arith.constant 0 : index
    %c0_6 = arith.constant 0 : index
    %4 = vector.load %arg2[%c0_5, %c0_6] : memref<4x128xbf16, #tpu.memory_space<vmem>>, vector<4x128xbf16>
    %cst_7 = arith.constant dense<0.000000e+00> : vector<512x128xf32>
    %5 = tpu.matmul %3, %4, %cst_7 {dimension_numbers = #tpu.dot_dimension_numbers<[1], [0], [0], [1], [0, 0, 1, 1], [], []>} : vector<512x4xbf16>, vector<4x128xbf16>, vector<512x128xf32> -> vector<512x128xf32>
    %6 = arith.addf %2, %5 : vector<512x128xf32>
    %c0_8 = arith.constant 0 : index
    %c0_9 = arith.constant 0 : index
    %7 = vector.load %arg5[%c0_8, %c0_9] : memref<512x1xf32, #tpu.memory_space<vmem>>, vector<512x1xf32>
    %8 = vector.broadcast %7 : vector<512x1xf32> to vector<512x128xf32>
    %9 = arith.addf %6, %8 : vector<512x128xf32>
    %cst_10 = arith.constant 0.000000e+00 : f32
    %10 = vector.broadcast %cst_10 : f32 to vector<512x128xf32>
    %11 = arith.maximumf %9, %10 : vector<512x128xf32>
    %c0_11 = arith.constant 0 : index
    %c0_12 = arith.constant 0 : index
    %12 = vector.load %arg6[%c0_11, %c0_12] : memref<512x1xf32, #tpu.memory_space<vmem>>, vector<512x1xf32>
    %13 = vector.broadcast %12 : vector<512x1xf32> to vector<512x128xf32>
    %14 = arith.mulf %11, %13 : vector<512x128xf32>
    %cst_13 = arith.constant dense<0.000000e+00> : vector<128xf32>
    %15 = vector.multi_reduction <add>, %14, %cst_13 [0] : vector<512x128xf32> to vector<128xf32>
    %16 = vector.shape_cast %15 : vector<128xf32> to vector<1x128xf32>
    %c0_14 = arith.constant 0 : index
    %c0_15 = arith.constant 0 : index
    %17 = vector.load %arg7[%c0_14, %c0_15] : memref<1x1xf32, #tpu.memory_space<vmem>>, vector<1x1xf32>
    %18 = vector.broadcast %17 : vector<1x1xf32> to vector<1x128xf32>
    %19 = arith.addf %16, %18 : vector<1x128xf32>
    %c0_16 = arith.constant 0 : index
    %c0_17 = arith.constant 0 : index
    %20 = vector.load %arg8[%c0_16, %c0_17] : memref<1x128xf32, #tpu.memory_space<vmem>>, vector<1x128xf32>
    tpu.vector_store %arg8[%c0_16, %c0_17], %19 {strides = array<i32>} : memref<1x128xf32, #tpu.memory_space<vmem>>, vector<1x128xf32>,
    return
  }
  func.func @transform_0(%arg0: i32) -> (i32, i32) {
    %c0_i32 = arith.constant 0 : i32
    %c0_i32_0 = arith.constant 0 : i32
    return %c0_i32, %arg0 : i32, i32
  }
  func.func @transform_1(%arg0: i32) -> (i32, i32) {
    %c0_i32 = arith.constant 0 : i32
    %c0_i32_0 = arith.constant 0 : i32
    return %c0_i32, %arg0 : i32, i32
  }
  func.func @transform_2(%arg0: i32) -> (i32, i32) {
    %c0_i32 = arith.constant 0 : i32
    %c0_i32_0 = arith.constant 0 : i32
    %c0_i32_1 = arith.constant 0 : i32
    return %c0_i32, %c0_i32_0 : i32, i32
  }
  func.func @transform_3(%arg0: i32) -> (i32, i32) {
    %c0_i32 = arith.constant 0 : i32
    %c0_i32_0 = arith.constant 0 : i32
    %c0_i32_1 = arith.constant 0 : i32
    return %c0_i32, %c0_i32_0 : i32, i32
  }
  func.func @transform_4(%arg0: i32) -> (i32, i32) {
    %c0_i32 = arith.constant 0 : i32
    %c0_i32_0 = arith.constant 0 : i32
    %c0_i32_1 = arith.constant 0 : i32
    return %c0_i32, %c0_i32_0 : i32, i32
  }
  func.func @transform_5(%arg0: i32) -> (i32, i32) {
    %c0_i32 = arith.constant 0 : i32
    %c0_i32_0 = arith.constant 0 : i32
    %c0_i32_1 = arith.constant 0 : i32
    return %c0_i32, %c0_i32_0 : i32, i32
  }
  func.func @transform_6(%arg0: i32) -> (i32, i32) {
    %c0_i32 = arith.constant 0 : i32
    %c0_i32_0 = arith.constant 0 : i32
    %c0_i32_1 = arith.constant 0 : i32
    return %c0_i32, %c0_i32_0 : i32, i32
  }
  func.func @transform_7(%arg0: i32) -> (i32, i32) {
    %c0_i32 = arith.constant 0 : i32
    %c0_i32_0 = arith.constant 0 : i32
    return %arg0, %c0_i32 : i32, i32
  }
}

</mosaic_0001>

<bundles_post_ra>
// kernel: tpu_custom_call.1
= control target key start
LH: loop header
LB: loop body
LE: loop exit
PB: predicated region body
PF: predicated region fallthrough
CT: control target
= control target key end

     0   :  { %s3890_s0 = inlined_call_operand.vmem [shape: bf16[16,128], index: 0, kind: input, shape index: {}]   ;;  %s3891_s1 = inlined_call_operand.vmem [shape: bf16[4,128], index: 1, kind: input, shape index: {}]   ;;  %s3892_s2 = inlined_call_operand.vmem [shape: bf16[512,16], index: 2, kind: input, shape index: {}]   ;;  %s3893_s3 = inlined_call_operand.vmem [shape: bf16[512,4], index: 3, kind: input, shape index: {}]   ;;  %s3894_s4 = inlined_call_operand.vmem [shape: f32[512,1], index: 4, kind: input, shape index: {}]   ;;  %s3895_s5 = inlined_call_operand.vmem [shape: f32[512,1], index: 5, kind: input, shape index: {}]   ;;  %s3896_s6 = inlined_call_operand.<no memory space> [shape: f32[1,1], index: 6, kind: input, shape index: {}]   ;;  %s3897_s7 = inlined_call_operand.hbm [shape: f32[1,128], index: 7, kind: output, shape index: {}]  }
   0x1   :  { %v12_v0 = vstv %s3896_s6 }
   0x2   :  { %13 = vst [vmem:[#allocation2] sm:$0x1] %v12_v0 }
   0x3   :  { %v1265_v1 = vld [vmem:[%s3894_s4 + $0x10] sm:$0xff]  ;;  %v1263_v2 = vld [vmem:[%s3894_s4] sm:$0xff]  ;;  %vm418_vm0 = vcmask 1041408   ;;  %v2803_v4 = vmov 0   ;;  %v1266_v7 = vld [vmem:[%s3894_s4 + $0x18] sm:$0xff]  ;;  %vm321_vm1 = vcmask 31744  }
   0x4   :  { %v160_v3 = vld [vmem:[%s3891_s1] sm:$0x3]  ;;  %2713 = vset.pattern.permute.xlu1 %v2803_v4  ;;  %2712 = vset.pattern.permute.xlu0 %v2803_v4  ;;  %v1264_v8 = vld [vmem:[%s3894_s4 + $0x8] sm:$0xff]  ;;  %vm877_vm2 = vcmask 130048   ;;  %v2719_v15 = vld [vmem:[%s3893_s3 + $0x10] sm:$0xff]  }
   0x5   :  { %v2714_v5 = vld [vmem:[%s3890_s0] sm:$0xff]   ;;  %v420_v6 = vsel %vm418_vm0, %v160_v3, 0  ;;  %1339 = vperm.xlu1 %2713, %v1265_v1   ;;  %1329 = vperm.xlu0 %2712, %v1263_v2   ;;  %v2717_v11 = vld [vmem:[%s3893_s3 + $0x8] sm:$0xff]   ;;  %v1270_v16 = vld [vmem:[%s3894_s4 + $0x38] sm:$0xff] }
   0x6   :  { %2709 = vmatprep.subr.msk.bf16.mxu1 %vm418_vm0, %v160_v3  ;;  %2579 = vmatprep.subr.bf16.mxu0 %v2714_v5  ;;  %v2715_v9 = vld [vmem:[%s3893_s3] sm:$0xff]   ;;  %v2718_v12 = vld [vmem:[%s3892_s2 + $0x8] sm:$0xff]   ;;  %v2720_v17 = vld [vmem:[%s3892_s2 + $0x10] sm:$0xff]  }
   0x7   :  { %2514 = vmatpush3.bf16.msra.mxu1 %v420_v6  ;;  %2580 = vmatpush3.bf16.msra.mxu0 %v2714_v5  ;;  %v2716_v10 = vld [vmem:[%s3892_s2] sm:$0xff]   ;;  %v1268_v13 = vld [vmem:[%s3894_s4 + $0x28] sm:$0xff]  ;;  %v1269_v18 = vld [vmem:[%s3894_s4 + $0x30] sm:$0xff] }
   0x8   :  { %2515 = vmatprep.mubr.msk.bf16.mxu1 %vm321_vm1, %v2715_v9  ;;  %2581 = vmatprep.mubr.msk.bf16.mxu0 %vm877_vm2, %v2716_v10  ;;  %v1267_v14 = vld [vmem:[%s3894_s4 + $0x20] sm:$0xff]  ;;  %v2721_v19 = vld [vmem:[%s3893_s3 + $0x18] sm:$0xff]   ;;  %v1272_v21 = vld [vmem:[%s3894_s4 + $0x48] sm:$0xff] }
   0x9   :  { %1344 = vperm.xlu1 %2713, %v1266_v7   ;;  %1334 = vperm.xlu0 %2712, %v1264_v8   ;;  %v2722_v20 = vld [vmem:[%s3892_s2 + $0x18] sm:$0xff]   ;;  %v1271_v22 = vld [vmem:[%s3894_s4 + $0x40] sm:$0xff]  ;;  %v1273_v26 = vld [vmem:[%s3894_s4 + $0x50] sm:$0xff] }
   0xa   :  { %2516 = vmatmul.mubr.msk.bf16.vlgmr.msra.gmra.mrb[0].mxu1 %vm321_vm1, %v2717_v11  ;;  %2582 = vmatmul.mubr.msk.bf16.vlgmr.msra.gmra.mrb[0].mxu0 %vm877_vm2, %v2718_v12  ;;  %v2723_v23 = vld [vmem:[%s3893_s3 + $0x20] sm:$0xff]   ;;  %v1274_v25 = vld [vmem:[%s3894_s4 + $0x58] sm:$0xff]  ;;  %v2725_v27 = vld [vmem:[%s3893_s3 + $0x28] sm:$0xff]  }
   0xb   :  { %2519 = vmatprep.mubr.msk.bf16.mxu1 %vm321_vm1, %v2719_v15  ;;  %2585 = vmatprep.mubr.msk.bf16.mxu0 %vm877_vm2, %v2720_v17  ;;  %v2724_v24 = vld [vmem:[%s3892_s2 + $0x20] sm:$0xff]   ;;  %v2726_v28 = vld [vmem:[%s3892_s2 + $0x28] sm:$0xff]   ;;  %v2727_v29 = vld [vmem:[%s3893_s3 + $0x30] sm:$0xff]  }
   0xc   :  { %v2728_v30 = vld [vmem:[%s3892_s2 + $0x30] sm:$0xff]   ;;  %v1276_v31 = vld [vmem:[%s3894_s4 + $0x68] sm:$0xff]  ;;  %v1275_v32 = vld [vmem:[%s3894_s4 + $0x60] sm:$0xff] }
   0xd   :  { %1354 = vperm.xlu1 %2713, %v1268_v13   ;;  %1349 = vperm.xlu0 %2712, %v1267_v14   ;;  %v1278_v33 = vld [vmem:[%s3894_s4 + $0x78] sm:$0xff]  ;;  %v1277_v34 = vld [vmem:[%s3894_s4 + $0x70] sm:$0xff]  ;;  %v2731_v37 = vld [vmem:[%s3893_s3 + $0x40] sm:$0xff]  }
   0xe   :  { %v2729_v35 = vld [vmem:[%s3893_s3 + $0x38] sm:$0xff]   ;;  %v2732_v38 = vld [vmem:[%s3892_s2 + $0x40] sm:$0xff]   ;;  %v1280_v39 = vld [vmem:[%s3894_s4 + $0x88] sm:$0xff] }
   0xf   :  { %v2730_v36 = vld [vmem:[%s3892_s2 + $0x38] sm:$0xff]   ;;  %v1279_v40 = vld [vmem:[%s3894_s4 + $0x80] sm:$0xff]  ;;  %v1281_v42 = vld [vmem:[%s3894_s4 + $0x90] sm:$0xff] }
  0x10   :  { %v1282_v41 = vld [vmem:[%s3894_s4 + $0x98] sm:$0xff]  ;;  %v2733_v43 = vld [vmem:[%s3893_s3 + $0x48] sm:$0xff]   ;;  %v2735_v45 = vld [vmem:[%s3893_s3 + $0x50] sm:$0xff]  }
  0x11   :  { %1364 = vperm.xlu1 %2713, %v1270_v16   ;;  %1359 = vperm.xlu0 %2712, %v1269_v18   ;;  %v2734_v44 = vld [vmem:[%s3892_s2 + $0x48] sm:$0xff]   ;;  %v2736_v46 = vld [vmem:[%s3892_s2 + $0x50] sm:$0xff]   ;;  %v1283_v48 = vld [vmem:[%s3894_s4 + $0xa0] sm:$0xff] }
  0x12   :  { %2520 = vmatmul.mubr.msk.bf16.gmra.mrb[4].mxu1 %vm321_vm1, %v2721_v19  ;;  %2586 = vmatmul.mubr.msk.bf16.gmra.mrb[4].mxu0 %vm877_vm2, %v2722_v20  ;;  %v1284_v47 = vld [vmem:[%s3894_s4 + $0xa8] sm:$0xff]  ;;  %v1286_v49 = vld [vmem:[%s3894_s4 + $0xb8] sm:$0xff]  ;;  %v1285_v50 = vld [vmem:[%s3894_s4 + $0xb0] sm:$0xff] }
  0x13   :  { %2523 = vmatprep.mubr.msk.bf16.mxu1 %vm321_vm1, %v2723_v23  ;;  %2589 = vmatprep.mubr.msk.bf16.mxu0 %vm877_vm2, %v2724_v24  ;;  %v2737_v51 = vld [vmem:[%s3893_s3 + $0x58] sm:$0xff]   ;;  %v2739_v53 = vld [vmem:[%s3893_s3 + $0x60] sm:$0xff]   ;;  %v1288_v55 = vld [vmem:[%s3894_s4 + $0xc8] sm:$0xff] }
  0x14   :  { %v2738_v52 = vld [vmem:[%s3892_s2 + $0x58] sm:$0xff]   ;;  %v2740_v54 = vld [vmem:[%s3892_s2 + $0x60] sm:$0xff]   ;;  %v1289_v58 = vld [vmem:[%s3894_s4 + $0xd0] sm:$0xff] }
  0x15   :  { %1374 = vperm.xlu1 %2713, %v1272_v21   ;;  %1369 = vperm.xlu0 %2712, %v1271_v22   ;;  %v1287_v56 = vld [vmem:[%s3894_s4 + $0xc0] sm:$0xff]  ;;  %v1290_v57 = vld [vmem:[%s3894_s4 + $0xd8] sm:$0xff]  ;;  %v2741_v59 = vld [vmem:[%s3893_s3 + $0x68] sm:$0xff]  }
  0x16   :  { %v2742_v60 = vld [vmem:[%s3892_s2 + $0x68] sm:$0xff]   ;;  %v2743_v61 = vld [vmem:[%s3893_s3 + $0x70] sm:$0xff]   ;;  %v1291_v0 = vld [vmem:[%s3894_s4 + $0xe0] sm:$0xff] }
  0x17   :  { %v2744_v62 = vld [vmem:[%s3892_s2 + $0x70] sm:$0xff]   ;;  %v1292_v63 = vld [vmem:[%s3894_s4 + $0xe8] sm:$0xff]  ;;  %v1294_v1 = vld [vmem:[%s3894_s4 + $0xf8] sm:$0xff] }
  0x18   :  { %v1293_v2 = vld [vmem:[%s3894_s4 + $0xf0] sm:$0xff]  ;;  %v2745_v3 = vld [vmem:[%s3893_s3 + $0x78] sm:$0xff]   ;;  %v2747_v5 = vld [vmem:[%s3893_s3 + $0x80] sm:$0xff]  }
  0x19   :  { %1384 = vperm.xlu1 %2713, %v1274_v25   ;;  %1379 = vperm.xlu0 %2712, %v1273_v26   ;;  %v2746_v4 = vld [vmem:[%s3892_s2 + $0x78] sm:$0xff]   ;;  %v2748_v6 = vld [vmem:[%s3892_s2 + $0x80] sm:$0xff]   ;;  %v1296_v7 = vld [vmem:[%s3894_s4 + $0x108] sm:$0xff] }
  0x1a   :  { %2524 = vmatmul.mubr.msk.bf16.gmra.mrb[8].mxu1 %vm321_vm1, %v2725_v27  ;;  %2590 = vmatmul.mubr.msk.bf16.gmra.mrb[8].mxu0 %vm877_vm2, %v2726_v28  ;;  %v1295_v8 = vld [vmem:[%s3894_s4 + $0x100] sm:$0xff]  ;;  %v1298_v9 = vld [vmem:[%s3894_s4 + $0x118] sm:$0xff]  ;;  %v1297_v10 = vld [vmem:[%s3894_s4 + $0x110] sm:$0xff] }
  0x1b   :  { %2527 = vmatprep.mubr.msk.bf16.mxu1 %vm321_vm1, %v2727_v29  ;;  %2593 = vmatprep.mubr.msk.bf16.mxu0 %vm877_vm2, %v2728_v30  ;;  %v2749_v11 = vld [vmem:[%s3893_s3 + $0x88] sm:$0xff]   ;;  %v2751_v13 = vld [vmem:[%s3893_s3 + $0x90] sm:$0xff]   ;;  %v1299_v16 = vld [vmem:[%s3894_s4 + $0x120] sm:$0xff] }
  0x1c   :  { %v2750_v12 = vld [vmem:[%s3892_s2 + $0x88] sm:$0xff]   ;;  %v2752_v14 = vld [vmem:[%s3892_s2 + $0x90] sm:$0xff]   ;;  %v1302_v17 = vld [vmem:[%s3894_s4 + $0x138] sm:$0xff] }
  0x1d   :  { %1394 = vperm.xlu1 %2713, %v1276_v31   ;;  %1389 = vperm.xlu0 %2712, %v1275_v32   ;;  %v1300_v15 = vld [vmem:[%s3894_s4 + $0x128] sm:$0xff]  ;;  %v1301_v18 = vld [vmem:[%s3894_s4 + $0x130] sm:$0xff]  ;;  %v2753_v19 = vld [vmem:[%s3893_s3 + $0x98] sm:$0xff]  }
  0x1e   :  { %v2754_v20 = vld [vmem:[%s3892_s2 + $0x98] sm:$0xff]   ;;  %v2755_v21 = vld [vmem:[%s3893_s3 + $0xa0] sm:$0xff]   ;;  %v1304_v23 = vld [vmem:[%s3894_s4 + $0x148] sm:$0xff] }
  0x1f   :  { %v2756_v22 = vld [vmem:[%s3892_s2 + $0xa0] sm:$0xff]   ;;  %v1306_v25 = vld [vmem:[%s3894_s4 + $0x158] sm:$0xff]  ;;  %v1305_v26 = vld [vmem:[%s3894_s4 + $0x150] sm:$0xff] }
  0x20   :  { %v1303_v24 = vld [vmem:[%s3894_s4 + $0x140] sm:$0xff]  ;;  %v2757_v27 = vld [vmem:[%s3893_s3 + $0xa8] sm:$0xff]   ;;  %v2759_v29 = vld [vmem:[%s3893_s3 + $0xb0] sm:$0xff]  }
  0x21   :  { %1404 = vperm.xlu1 %2713, %v1278_v33   ;;  %1399 = vperm.xlu0 %2712, %v1277_v34   ;;  %v2758_v28 = vld [vmem:[%s3892_s2 + $0xa8] sm:$0xff]   ;;  %v2760_v30 = vld [vmem:[%s3892_s2 + $0xb0] sm:$0xff]   ;;  %v1307_v32 = vld [vmem:[%s3894_s4 + $0x160] sm:$0xff] }
  0x22   :  { %2528 = vmatmul.mubr.msk.bf16.gmra.mrb[12].mxu1 %vm321_vm1, %v2729_v35  ;;  %2594 = vmatmul.mubr.msk.bf16.gmra.mrb[12].mxu0 %vm877_vm2, %v2730_v36  ;;  %v1308_v31 = vld [vmem:[%s3894_s4 + $0x168] sm:$0xff]  ;;  %v1310_v33 = vld [vmem:[%s3894_s4 + $0x178] sm:$0xff]  ;;  %v1309_v34 = vld [vmem:[%s3894_s4 + $0x170] sm:$0xff] }
  0x23   :  { %2531 = vmatprep.mubr.msk.bf16.mxu1 %vm321_vm1, %v2731_v37  ;;  %2597 = vmatprep.mubr.msk.bf16.mxu0 %vm877_vm2, %v2732_v38  ;;  %v2761_v35 = vld [vmem:[%s3893_s3 + $0xb8] sm:$0xff]   ;;  %v2763_v37 = vld [vmem:[%s3893_s3 + $0xc0] sm:$0xff]  }
  0x24   :  { %v2762_v36 = vld [vmem:[%s3892_s2 + $0xb8] sm:$0xff]   ;;  %v2764_v38 = vld [vmem:[%s3892_s2 + $0xc0] sm:$0xff]  }
  0x25   :  { %1414 = vperm.xlu1 %2713, %v1280_v39   ;;  %1409 = vperm.xlu0 %2712, %v1279_v40   ;;  %v1312_v39 = vld [vmem:[%s3894_s4 + $0x188] sm:$0xff]  ;;  %v1311_v40 = vld [vmem:[%s3894_s4 + $0x180] sm:$0xff] }
  0x29   :  { %1424 = vperm.xlu1 %2713, %v1282_v41   ;;  %1419 = vperm.xlu0 %2712, %v1281_v42   ;;  %v1314_v41 = vld [vmem:[%s3894_s4 + $0x198] sm:$0xff]  ;;  %v1313_v42 = vld [vmem:[%s3894_s4 + $0x190] sm:$0xff] }
  0x2a   :  { %2532 = vmatmul.mubr.msk.bf16.gmra.mrb[16].mxu1 %vm321_vm1, %v2733_v43  ;;  %2598 = vmatmul.mubr.msk.bf16.gmra.mrb[16].mxu0 %vm877_vm2, %v2734_v44  ;;  %v2765_v43 = vld [vmem:[%s3893_s3 + $0xc8] sm:$0xff]  }
  0x2b   :  { %2535 = vmatprep.mubr.msk.bf16.mxu1 %vm321_vm1, %v2735_v45  ;;  %2601 = vmatprep.mubr.msk.bf16.mxu0 %vm877_vm2, %v2736_v46  ;;  %v2766_v44 = vld [vmem:[%s3892_s2 + $0xc8] sm:$0xff]   ;;  %v2767_v45 = vld [vmem:[%s3893_s3 + $0xd0] sm:$0xff]  }
  0x2c   :  { %v2768_v46 = vld [vmem:[%s3892_s2 + $0xd0] sm:$0xff]  }
  0x2d   :  { %1434 = vperm.xlu1 %2713, %v1284_v47   ;;  %1429 = vperm.xlu0 %2712, %v1283_v48   ;;  %v1316_v47 = vld [vmem:[%s3894_s4 + $0x1a8] sm:$0xff]  ;;  %v1315_v48 = vld [vmem:[%s3894_s4 + $0x1a0] sm:$0xff] }
  0x31   :  { %1444 = vperm.xlu1 %2713, %v1286_v49   ;;  %1439 = vperm.xlu0 %2712, %v1285_v50  }
  0x32   :  { %2536 = vmatmul.mubr.msk.bf16.gmra.mrb[20].mxu1 %vm321_vm1, %v2737_v51  ;;  %2602 = vmatmul.mubr.msk.bf16.gmra.mrb[20].mxu0 %vm877_vm2, %v2738_v52 }
  0x33   :  { %2539 = vmatprep.mubr.msk.bf16.mxu1 %vm321_vm1, %v2739_v53  ;;  %2605 = vmatprep.mubr.msk.bf16.mxu0 %vm877_vm2, %v2740_v54 }
  0x35   :  { %1454 = vperm.xlu1 %2713, %v1288_v55   ;;  %1449 = vperm.xlu0 %2712, %v1287_v56  }
  0x39   :  { %1464 = vperm.xlu1 %2713, %v1290_v57   ;;  %1459 = vperm.xlu0 %2712, %v1289_v58  }
  0x3a   :  { %2540 = vmatmul.mubr.msk.bf16.gmra.mrb[24].mxu1 %vm321_vm1, %v2741_v59  ;;  %2606 = vmatmul.mubr.msk.bf16.gmra.mrb[24].mxu0 %vm877_vm2, %v2742_v60 }
  0x3b   :  { %2543 = vmatprep.mubr.msk.bf16.mxu1 %vm321_vm1, %v2743_v61  ;;  %2609 = vmatprep.mubr.msk.bf16.mxu0 %vm877_vm2, %v2744_v62 }
  0x3d   :  { %1474 = vperm.xlu1 %2713, %v1292_v63   ;;  %1469 = vperm.xlu0 %2712, %v1291_v0  }
  0x41   :  { %1484 = vperm.xlu1 %2713, %v1294_v1   ;;  %1479 = vperm.xlu0 %2712, %v1293_v2  }
  0x42   :  { %2544 = vmatmul.mubr.msk.bf16.gmra.mrb[28].mxu1 %vm321_vm1, %v2745_v3  ;;  %2610 = vmatmul.mubr.msk.bf16.gmra.mrb[28].mxu0 %vm877_vm2, %v2746_v4 }
  0x43   :  { %2547 = vmatprep.mubr.msk.bf16.mxu1 %vm321_vm1, %v2747_v5  ;;  %2613 = vmatprep.mubr.msk.bf16.mxu0 %vm877_vm2, %v2748_v6 }
  0x45   :  { %1494 = vperm.xlu1 %2713, %v1296_v7   ;;  %1489 = vperm.xlu0 %2712, %v1295_v8  }
  0x49   :  { %1504 = vperm.xlu1 %2713, %v1298_v9   ;;  %1499 = vperm.xlu0 %2712, %v1297_v10  }
  0x4a   :  { %2548 = vmatmul.mubr.msk.bf16.gmra.mrb[32].mxu1 %vm321_vm1, %v2749_v11  ;;  %2614 = vmatmul.mubr.msk.bf16.gmra.mrb[32].mxu0 %vm877_vm2, %v2750_v12 }
  0x4b   :  { %2551 = vmatprep.mubr.msk.bf16.mxu1 %vm321_vm1, %v2751_v13  ;;  %2617 = vmatprep.mubr.msk.bf16.mxu0 %vm877_vm2, %v2752_v14 }
  0x4d   :  { %1514 = vperm.xlu1 %2713, %v1300_v15   ;;  %1509 = vperm.xlu0 %2712, %v1299_v16  }
  0x51   :  { %1524 = vperm.xlu1 %2713, %v1302_v17   ;;  %1519 = vperm.xlu0 %2712, %v1301_v18  }
  0x52   :  { %2552 = vmatmul.mubr.msk.bf16.gmra.mrb[36].mxu1 %vm321_vm1, %v2753_v19  ;;  %2618 = vmatmul.mubr.msk.bf16.gmra.mrb[36].mxu0 %vm877_vm2, %v2754_v20 }
  0x53   :  { %2555 = vmatprep.mubr.msk.bf16.mxu1 %vm321_vm1, %v2755_v21  ;;  %2621 = vmatprep.mubr.msk.bf16.mxu0 %vm877_vm2, %v2756_v22 }
  0x55   :  { %1534 = vperm.xlu1 %2713, %v1304_v23   ;;  %1529 = vperm.xlu0 %2712, %v1303_v24  }
  0x59   :  { %1544 = vperm.xlu1 %2713, %v1306_v25   ;;  %1539 = vperm.xlu0 %2712, %v1305_v26  }
  0x5a   :  { %2556 = vmatmul.mubr.msk.bf16.gmra.mrb[40].mxu1 %vm321_vm1, %v2757_v27  ;;  %2622 = vmatmul.mubr.msk.bf16.gmra.mrb[40].mxu0 %vm877_vm2, %v2758_v28 }
  0x5b   :  { %2559 = vmatprep.mubr.msk.bf16.mxu1 %vm321_vm1, %v2759_v29  ;;  %2625 = vmatprep.mubr.msk.bf16.mxu0 %vm877_vm2, %v2760_v30 }
  0x5d   :  { %1554 = vperm.xlu1 %2713, %v1308_v31   ;;  %1549 = vperm.xlu0 %2712, %v1307_v32  }
  0x61   :  { %1564 = vperm.xlu1 %2713, %v1310_v33   ;;  %1559 = vperm.xlu0 %2712, %v1309_v34  }
  0x62   :  { %2560 = vmatmul.mubr.msk.bf16.gmra.mrb[44].mxu1 %vm321_vm1, %v2761_v35  ;;  %2626 = vmatmul.mubr.msk.bf16.gmra.mrb[44].mxu0 %vm877_vm2, %v2762_v36 }
  0x63   :  { %2563 = vmatprep.mubr.msk.bf16.mxu1 %vm321_vm1, %v2763_v37  ;;  %2629 = vmatprep.mubr.msk.bf16.mxu0 %vm877_vm2, %v2764_v38 }
  0x65   :  { %1574 = vperm.xlu1 %2713, %v1312_v39   ;;  %1569 = vperm.xlu0 %2712, %v1311_v40  }
  0x69   :  { %1584 = vperm.xlu1 %2713, %v1314_v41   ;;  %1579 = vperm.xlu0 %2712, %v1313_v42  }
  0x6a   :  { %2564 = vmatmul.mubr.msk.bf16.gmra.mrb[48].mxu1 %vm321_vm1, %v2765_v43 }
  0x6b   :  { %14 = vsyncpa [#allocation4], 0  ;;  %2630 = vmatmul.mubr.msk.bf16.gmra.mrb[48].mxu0 %vm877_vm2, %v2766_v44  ;;  %2567 = vmatprep.mubr.msk.bf16.mxu1 %vm321_vm1, %v2767_v45  ;;  %v1318_v49 = vld [vmem:[%s3894_s4 + $0x1b8] sm:$0xff]  ;;  %v1317_v50 = vld [vmem:[%s3894_s4 + $0x1b0] sm:$0xff] }
  0x6c   :  { %2633 = vmatprep.mubr.msk.bf16.mxu0 %vm877_vm2, %v2768_v46  ;;  %v2769_v51 = vld [vmem:[%s3893_s3 + $0xd8] sm:$0xff]   ;;  %v2771_v53 = vld [vmem:[%s3893_s3 + $0xe0] sm:$0xff]   ;;  %v1320_v55 = vld [vmem:[%s3894_s4 + $0x1c8] sm:$0xff] }
  0x6d   :  { %1594 = vperm.xlu1 %2713, %v1316_v47   ;;  %1589 = vperm.xlu0 %2712, %v1315_v48   ;;  %v2770_v52 = vld [vmem:[%s3892_s2 + $0xd8] sm:$0xff]   ;;  %v2772_v54 = vld [vmem:[%s3892_s2 + $0xe0] sm:$0xff]   ;;  %v1321_v58 = vld [vmem:[%s3894_s4 + $0x1d0] sm:$0xff] }
  0x6e   :  { %v1319_v56 = vld [vmem:[%s3894_s4 + $0x1c0] sm:$0xff]  ;;  %v1322_v57 = vld [vmem:[%s3894_s4 + $0x1d8] sm:$0xff]  ;;  %v2773_v59 = vld [vmem:[%s3893_s3 + $0xe8] sm:$0xff]  }
  0x6f   :  { %v2774_v60 = vld [vmem:[%s3892_s2 + $0xe8] sm:$0xff]   ;;  %v2775_v61 = vld [vmem:[%s3893_s3 + $0xf0] sm:$0xff]   ;;  %v1323_v0 = vld [vmem:[%s3894_s4 + $0x1e0] sm:$0xff] }
  0x70   :  { %v2776_v62 = vld [vmem:[%s3892_s2 + $0xf0] sm:$0xff]   ;;  %v1324_v63 = vld [vmem:[%s3894_s4 + $0x1e8] sm:$0xff]  ;;  %v1326_v1 = vld [vmem:[%s3894_s4 + $0x1f8] sm:$0xff] }
  0x71   :  { %1604 = vperm.xlu1 %2713, %v1318_v49   ;;  %1599 = vperm.xlu0 %2712, %v1317_v50   ;;  %v1325_v2 = vld [vmem:[%s3894_s4 + $0x1f0] sm:$0xff]  ;;  %v2777_v3 = vld [vmem:[%s3893_s3 + $0xf8] sm:$0xff]   ;;  %v1776_v5 = vld [vmem:[%s3895_s5 + $0x8] sm:$0xff] }
  0x72   :  { %2568 = vmatmul.mubr.msk.bf16.gmra.mrb[52].mxu1 %vm321_vm1, %v2769_v51  ;;  %v2778_v4 = vld [vmem:[%s3892_s2 + $0xf8] sm:$0xff]   ;;  %v1775_v6 = vld [vmem:[%s3895_s5] sm:$0xff]  ;;  %v1777_v10 = vld [vmem:[%s3895_s5 + $0x10] sm:$0xff] }
  0x73   :  { %2634 = vmatmul.mubr.msk.bf16.gmra.mrb[52].mxu0 %vm877_vm2, %v2770_v52  ;;  %2571 = vmatprep.mubr.msk.bf16.mxu1 %vm321_vm1, %v2771_v53  ;;  %v1778_v9 = vld [vmem:[%s3895_s5 + $0x18] sm:$0xff]  ;;  %v1780_v13 = vld [vmem:[%s3895_s5 + $0x28] sm:$0xff]  ;;  %v1779_v14 = vld [vmem:[%s3895_s5 + $0x20] sm:$0xff] }
  0x74   :  { %2637 = vmatprep.mubr.msk.bf16.mxu0 %vm877_vm2, %v2772_v54  ;;  %v1782_v17 = vld [vmem:[%s3895_s5 + $0x38] sm:$0xff]  ;;  %v1781_v18 = vld [vmem:[%s3895_s5 + $0x30] sm:$0xff]  ;;  %v1784_v21 = vld [vmem:[%s3895_s5 + $0x48] sm:$0xff] }
  0x75   :  { %1614 = vperm.xlu1 %2713, %v1320_v55   ;;  %1609 = vperm.xlu0 %2712, %v1319_v56   ;;  %v1783_v22 = vld [vmem:[%s3895_s5 + $0x40] sm:$0xff]  ;;  %v1786_v25 = vld [vmem:[%s3895_s5 + $0x58] sm:$0xff]  ;;  %v1785_v26 = vld [vmem:[%s3895_s5 + $0x50] sm:$0xff] }
  0x76   :  { %v1788_v29 = vld [vmem:[%s3895_s5 + $0x68] sm:$0xff]  ;;  %v1787_v30 = vld [vmem:[%s3895_s5 + $0x60] sm:$0xff]  ;;  %v1790_v33 = vld [vmem:[%s3895_s5 + $0x78] sm:$0xff] }
  0x77   :  { %v1789_v34 = vld [vmem:[%s3895_s5 + $0x70] sm:$0xff]  ;;  %v1792_v37 = vld [vmem:[%s3895_s5 + $0x88] sm:$0xff]  ;;  %v1791_v38 = vld [vmem:[%s3895_s5 + $0x80] sm:$0xff] }
  0x78   :  { %v1794_v41 = vld [vmem:[%s3895_s5 + $0x98] sm:$0xff]  ;;  %v1793_v42 = vld [vmem:[%s3895_s5 + $0x90] sm:$0xff]  ;;  %v1796_v45 = vld [vmem:[%s3895_s5 + $0xa8] sm:$0xff] }
  0x79   :  { %1624 = vperm.xlu1 %2713, %v1322_v57   ;;  %1619 = vperm.xlu0 %2712, %v1321_v58   ;;  %v1795_v46 = vld [vmem:[%s3895_s5 + $0xa0] sm:$0xff]  ;;  %v1798_v49 = vld [vmem:[%s3895_s5 + $0xb8] sm:$0xff]  ;;  %v1797_v50 = vld [vmem:[%s3895_s5 + $0xb0] sm:$0xff] }
  0x7a   :  { %2572 = vmatmul.mubr.msk.bf16.gmra.mrb[56].mxu1 %vm321_vm1, %v2773_v59  ;;  %v1800_v53 = vld [vmem:[%s3895_s5 + $0xc8] sm:$0xff]  ;;  %v1799_v54 = vld [vmem:[%s3895_s5 + $0xc0] sm:$0xff]  ;;  %v1802_v57 = vld [vmem:[%s3895_s5 + $0xd8] sm:$0xff] }
  0x7b   :  { %2638 = vmatmul.mubr.msk.bf16.gmra.mrb[56].mxu0 %vm877_vm2, %v2774_v60  ;;  %2575 = vmatprep.mubr.msk.bf16.mxu1 %vm321_vm1, %v2775_v61  ;;  %v1801_v58 = vld [vmem:[%s3895_s5 + $0xd0] sm:$0xff]  ;;  %v1804_v61 = vld [vmem:[%s3895_s5 + $0xe8] sm:$0xff] }
  0x7c   :  { %2641 = vmatprep.mubr.msk.bf16.mxu0 %vm877_vm2, %v2776_v62  ;;  %v1803_v62 = vld [vmem:[%s3895_s5 + $0xe0] sm:$0xff] }
  0x7d   :  { %1634 = vperm.xlu1 %2713, %v1324_v63   ;;  %1629 = vperm.xlu0 %2712, %v1323_v0  }
  0x81   :  { %1644 = vperm.xlu1 %2713, %v1326_v1   ;;  %1639 = vperm.xlu0 %2712, %v1325_v2   ;;  %v1806_v1 = vld [vmem:[%s3895_s5 + $0xf8] sm:$0xff]  ;;  %v1805_v2 = vld [vmem:[%s3895_s5 + $0xf0] sm:$0xff] }
  0x82   :  { %2576 = vmatmul.mubr.msk.bf16.gmra.mrb[60].mxu1 %vm321_vm1, %v2777_v3 }
  0x83   :  { %2642 = vmatmul.mubr.msk.bf16.gmra.mrb[60].mxu0 %vm877_vm2, %v2778_v4 }
  0x84   :  { %v3308_v7 = vpop.permute.xlu1 %1339  ;;  %v3310_v8 = vpop.permute.xlu0 %1329 }
  0x85   :  { %1846 = vperm.xlu1 %2713, %v1776_v5   ;;  %1841 = vperm.xlu0 %2712, %v1775_v6   ;;  %v1808_v5 = vld [vmem:[%s3895_s5 + $0x108] sm:$0xff]  ;;  %v1807_v6 = vld [vmem:[%s3895_s5 + $0x100] sm:$0xff] }
  0x88   :  { %v3318_v11 = vpop.permute.xlu1 %1344  ;;  %v3320_v12 = vpop.permute.xlu0 %1334 }
  0x89   :  { %1856 = vperm.xlu1 %2713, %v1778_v9   ;;  %1851 = vperm.xlu0 %2712, %v1777_v10  }
  0x8c   :  { %v3328_v15 = vpop.permute.xlu1 %1354  ;;  %v3330_v16 = vpop.permute.xlu0 %1349 }
  0x8d   :  { %1866 = vperm.xlu1 %2713, %v1780_v13   ;;  %1861 = vperm.xlu0 %2712, %v1779_v14   ;;  %v1810_v13 = vld [vmem:[%s3895_s5 + $0x118] sm:$0xff]  ;;  %v1809_v14 = vld [vmem:[%s3895_s5 + $0x110] sm:$0xff] }
  0x90   :  { %v3338_v19 = vpop.permute.xlu1 %1364  ;;  %v3340_v20 = vpop.permute.xlu0 %1359 }
  0x91   :  { %1876 = vperm.xlu1 %2713, %v1782_v17   ;;  %1871 = vperm.xlu0 %2712, %v1781_v18  }
  0x94   :  { %v3348_v23 = vpop.permute.xlu1 %1374  ;;  %v3350_v24 = vpop.permute.xlu0 %1369 }
  0x95   :  { %1886 = vperm.xlu1 %2713, %v1784_v21   ;;  %1881 = vperm.xlu0 %2712, %v1783_v22   ;;  %v1812_v21 = vld [vmem:[%s3895_s5 + $0x128] sm:$0xff]  ;;  %v1811_v22 = vld [vmem:[%s3895_s5 + $0x120] sm:$0xff] }
  0x98   :  { %v3358_v27 = vpop.permute.xlu1 %1384  ;;  %v3360_v28 = vpop.permute.xlu0 %1379 }
  0x99   :  { %1896 = vperm.xlu1 %2713, %v1786_v25   ;;  %1891 = vperm.xlu0 %2712, %v1785_v26  }
  0x9c   :  { %v3368_v31 = vpop.permute.xlu1 %1394  ;;  %v3370_v32 = vpop.permute.xlu0 %1389 }
  0x9d   :  { %1906 = vperm.xlu1 %2713, %v1788_v29   ;;  %1901 = vperm.xlu0 %2712, %v1787_v30   ;;  %v1814_v29 = vld [vmem:[%s3895_s5 + $0x138] sm:$0xff]  ;;  %v1813_v30 = vld [vmem:[%s3895_s5 + $0x130] sm:$0xff] }
  0xa0   :  { %v3378_v35 = vpop.permute.xlu1 %1404  ;;  %v3380_v36 = vpop.permute.xlu0 %1399 }
  0xa1   :  { %1916 = vperm.xlu1 %2713, %v1790_v33   ;;  %1911 = vperm.xlu0 %2712, %v1789_v34  }
  0xa4   :  { %v3388_v39 = vpop.permute.xlu1 %1414  ;;  %v3390_v40 = vpop.permute.xlu0 %1409 }
  0xa5   :  { %1926 = vperm.xlu1 %2713, %v1792_v37   ;;  %1921 = vperm.xlu0 %2712, %v1791_v38   ;;  %v1816_v37 = vld [vmem:[%s3895_s5 + $0x148] sm:$0xff]  ;;  %v1815_v38 = vld [vmem:[%s3895_s5 + $0x140] sm:$0xff] }
  0xa8   :  { %v3398_v43 = vpop.permute.xlu1 %1424  ;;  %v3400_v44 = vpop.permute.xlu0 %1419 }
  0xa9   :  { %1936 = vperm.xlu1 %2713, %v1794_v41   ;;  %1931 = vperm.xlu0 %2712, %v1793_v42  }
  0xac   :  { %v3408_v47 = vpop.permute.xlu1 %1434  ;;  %v3410_v48 = vpop.permute.xlu0 %1429 }
  0xad   :  { %1946 = vperm.xlu1 %2713, %v1796_v45   ;;  %1941 = vperm.xlu0 %2712, %v1795_v46   ;;  %v1818_v45 = vld [vmem:[%s3895_s5 + $0x158] sm:$0xff]  ;;  %v1817_v46 = vld [vmem:[%s3895_s5 + $0x150] sm:$0xff] }
  0xb0   :  { %v3418_v51 = vpop.permute.xlu1 %1444  ;;  %v3420_v52 = vpop.permute.xlu0 %1439 }
  0xb1   :  { %1956 = vperm.xlu1 %2713, %v1798_v49   ;;  %1951 = vperm.xlu0 %2712, %v1797_v50  }
  0xb4   :  { %v3428_v55 = vpop.permute.xlu1 %1454  ;;  %v3430_v56 = vpop.permute.xlu0 %1449 }
  0xb5   :  { %1966 = vperm.xlu1 %2713, %v1800_v53   ;;  %1961 = vperm.xlu0 %2712, %v1799_v54   ;;  %v1820_v53 = vld [vmem:[%s3895_s5 + $0x168] sm:$0xff]  ;;  %v1819_v54 = vld [vmem:[%s3895_s5 + $0x160] sm:$0xff] }
  0xb8   :  { %v3438_v59 = vpop.permute.xlu1 %1464  ;;  %v3440_v60 = vpop.permute.xlu0 %1459 }
  0xb9   :  { %1976 = vperm.xlu1 %2713, %v1802_v57   ;;  %1971 = vperm.xlu0 %2712, %v1801_v58  }
  0xbc   :  { %v3448_v63 = vpop.permute.xlu1 %1474  ;;  %v3450_v0 = vpop.permute.xlu0 %1469 }
  0xbd   :  { %3898 = vst [vmem:[#allocation6_spill] sm:$0xff] %v3448_v63  ;;  %1986 = vperm.xlu1 %2713, %v1804_v61   ;;  %1981 = vperm.xlu0 %2712, %v1803_v62  }
  0xc0   :  { %v3458_v3 = vpop.permute.xlu1 %1484  ;;  %v3460_v4 = vpop.permute.xlu0 %1479 }
  0xc1   :  { %3899 = vst [vmem:[#allocation7_spill] sm:$0xff] %v3458_v3  ;;  %3900 = vst [vmem:[#allocation8_spill] sm:$0xff] %v3460_v4  ;;  %1996 = vperm.xlu1 %2713, %v1806_v1   ;;  %1991 = vperm.xlu0 %2712, %v1805_v2   ;;  %v1822_v2 = vld [vmem:[%s3895_s5 + $0x178] sm:$0xff] }
  0xc4   :  { %v3468_v9 = vpop.permute.xlu1 %1494  ;;  %v3470_v10 = vpop.permute.xlu0 %1489 }
  0xc5   :  { %3901 = vst [vmem:[#allocation9_spill] sm:$0xff] %v3468_v9  ;;  %3902 = vst [vmem:[#allocation10_spill] sm:$0xff] %v3470_v10  ;;  %2006 = vperm.xlu1 %2713, %v1808_v5   ;;  %2001 = vperm.xlu0 %2712, %v1807_v6   ;;  %v1821_v5 = vld [vmem:[%s3895_s5 + $0x170] sm:$0xff] }
  0xc8   :  { %v3478_v17 = vpop.permute.xlu1 %1504  ;;  %v3480_v18 = vpop.permute.xlu0 %1499 }
  0xc9   :  { %3903 = vst [vmem:[#allocation11_spill] sm:$0xff] %v3478_v17  ;;  %3904 = vst [vmem:[#allocation12_spill] sm:$0xff] %v3480_v18  ;;  %2016 = vperm.xlu1 %2713, %v1810_v13   ;;  %2011 = vperm.xlu0 %2712, %v1809_v14  }
  0xcc   :  { %v3488_v25 = vpop.permute.xlu1 %1514  ;;  %v3490_v26 = vpop.permute.xlu0 %1509 }
  0xcd   :  { %3905 = vst [vmem:[#allocation13_spill] sm:$0xff] %v3488_v25  ;;  %3906 = vst [vmem:[#allocation14_spill] sm:$0xff] %v3490_v26  ;;  %2026 = vperm.xlu1 %2713, %v1812_v21   ;;  %2021 = vperm.xlu0 %2712, %v1811_v22  }
  0xd0   :  { %v3498_v33 = vpop.permute.xlu1 %1524  ;;  %v3500_v34 = vpop.permute.xlu0 %1519 }
  0xd1   :  { %3907 = vst [vmem:[#allocation15_spill] sm:$0xff] %v3498_v33  ;;  %3908 = vst [vmem:[#allocation16_spill] sm:$0xff] %v3500_v34  ;;  %2036 = vperm.xlu1 %2713, %v1814_v29   ;;  %2031 = vperm.xlu0 %2712, %v1813_v30  }
  0xd4   :  { %v3508_v41 = vpop.permute.xlu1 %1534  ;;  %v3510_v42 = vpop.permute.xlu0 %1529 }
  0xd5   :  { %3909 = vst [vmem:[#allocation17_spill] sm:$0xff] %v3508_v41  ;;  %3910 = vst [vmem:[#allocation18_spill] sm:$0xff] %v3510_v42  ;;  %2046 = vperm.xlu1 %2713, %v1816_v37   ;;  %2041 = vperm.xlu0 %2712, %v1815_v38  }
  0xd8   :  { %v3518_v49 = vpop.permute.xlu1 %1544  ;;  %v3520_v50 = vpop.permute.xlu0 %1539 }
  0xd9   :  { %3911 = vst [vmem:[#allocation19_spill] sm:$0xff] %v3518_v49  ;;  %3912 = vst [vmem:[#allocation20_spill] sm:$0xff] %v3520_v50  ;;  %2056 = vperm.xlu1 %2713, %v1818_v45   ;;  %2051 = vperm.xlu0 %2712, %v1817_v46   ;;  %v1824_v46 = vld [vmem:[%s3895_s5 + $0x188] sm:$0xff] }
  0xdc   :  { %v3528_v57 = vpop.permute.xlu1 %1554  ;;  %v3530_v58 = vpop.permute.xlu0 %1549 }
  0xdd   :  { %3913 = vst [vmem:[#allocation21_spill] sm:$0xff] %v3528_v57  ;;  %3914 = vst [vmem:[#allocation22_spill] sm:$0xff] %v3530_v58  ;;  %2066 = vperm.xlu1 %2713, %v1820_v53   ;;  %2061 = vperm.xlu0 %2712, %v1819_v54   ;;  %v2517_v61 = vpop.f32.mrb[0].mxu1  ;;  %v2583_v62 = vpop.f32.mrb[0].mxu0  ;;  %v1823_v53 = vld [vmem:[%s3895_s5 + $0x180] sm:$0xff] }
  0xde   :  { %v456_v1 = vpop.f32.mrb[1].mxu1  ;;  %v3538_v6 = vadd.f32 %v2583_v62, %v2517_v61  ;;  %v1008_v13 = vpop.f32.mrb[1].mxu0 }
  0xdf   :  { %v2518_v14 = vpop.f32.mrb[2].mxu1  ;;  %v3540_v21 = vadd.f32 %v1008_v13, %v456_v1  ;;  %v2584_v22 = vpop.f32.mrb[2].mxu0  ;;  %v1826_v13 = vld [vmem:[%s3895_s5 + $0x198] sm:$0xff] }
  0xe0   :  { %v3542_v29 = vpop.permute.xlu1 %1564  ;;  %v3544_v30 = vadd.f32 %v2584_v22, %v2518_v14  ;;  %v3546_v37 = vpop.permute.xlu0 %1559  ;;  %v1825_v14 = vld [vmem:[%s3895_s5 + $0x190] sm:$0xff] }
  0xe1   :  { %3915 = vst [vmem:[#allocation23_spill] sm:$0xff] %v3542_v29  ;;  %3916 = vst [vmem:[#allocation24_spill] sm:$0xff] %v3546_v37  ;;  %v459_v38 = vpop.f32.mrb[3].mxu1  ;;  %2076 = vperm.xlu1 %2713, %v1822_v2   ;;  %2071 = vperm.xlu0 %2712, %v1821_v5   ;;  %v1011_v45 = vpop.f32.mrb[3].mxu0 }
  0xe2   :  { %v3554_v54 = vadd.f32 %v1011_v45, %v459_v38 }
  0xe4   :  { %v3556_v61 = vpop.permute.xlu1 %1574  ;;  %v3558_v62 = vpop.permute.xlu0 %1569 }
  0xe5   :  { %3917 = vst [vmem:[#allocation25_spill] sm:$0xff] %v3556_v61  ;;  %3918 = vst [vmem:[#allocation26_spill] sm:$0xff] %v3558_v62  ;;  %2086 = vperm.xlu1 %2713, %v1824_v46   ;;  %2081 = vperm.xlu0 %2712, %v1823_v53   ;;  %v2521_v1 = vpop.f32.mrb[4].mxu1  ;;  %v2587_v2 = vpop.f32.mrb[4].mxu0 }
  0xe6   :  { %v472_v5 = vpop.f32.mrb[5].mxu1  ;;  %v3566_v22 = vadd.f32 %v2587_v2, %v2521_v1  ;;  %v1024_v38 = vpop.f32.mrb[5].mxu0  ;;  %v1828_v1 = vld [vmem:[%s3895_s5 + $0x1a8] sm:$0xff]  ;;  %v1827_v2 = vld [vmem:[%s3895_s5 + $0x1a0] sm:$0xff] }
  0xe7   :  { %v2522_v45 = vpop.f32.mrb[6].mxu1  ;;  %v3568_v61 = vadd.f32 %v1024_v38, %v472_v5  ;;  %v2588_v62 = vpop.f32.mrb[6].mxu0 }
  0xe8   :  { %v3570_v46 = vpop.permute.xlu1 %1584  ;;  %v3572_v53 = vadd.f32 %v2588_v62, %v2522_v45  ;;  %v3574_v29 = vpop.permute.xlu0 %1579 }
  0xe9   :  { %3919 = vst [vmem:[#allocation27_spill] sm:$0xff] %v3570_v46  ;;  %3920 = vst [vmem:[#allocation28_spill] sm:$0xff] %v3574_v29  ;;  %v475_v37 = vpop.f32.mrb[7].mxu1  ;;  %2096 = vperm.xlu1 %2713, %v1826_v13   ;;  %2091 = vperm.xlu0 %2712, %v1825_v14   ;;  %v1027_v57 = vpop.f32.mrb[7].mxu0  ;;  %v1830_v46 = vld [vmem:[%s3895_s5 + $0x1b8] sm:$0xff]  ;;  %v1829_v29 = vld [vmem:[%s3895_s5 + $0x1b0] sm:$0xff] }
  0xea   :  { %v3582_v5 = vadd.f32 %v1027_v57, %v475_v37 }
  0xec   :  { %v3584_v38 = vpop.permute.xlu1 %1594  ;;  %v3586_v62 = vpop.permute.xlu0 %1589 }
  0xed   :  { %3921 = vst [vmem:[#allocation29_spill] sm:$0xff] %v3584_v38  ;;  %3922 = vst [vmem:[#allocation30_spill] sm:$0xff] %v3586_v62  ;;  %2106 = vperm.xlu1 %2713, %v1828_v1   ;;  %2101 = vperm.xlu0 %2712, %v1827_v2   ;;  %v2525_v45 = vpop.f32.mrb[8].mxu1  ;;  %v2591_v13 = vpop.f32.mrb[8].mxu0 }
  0xee   :  { %v488_v14 = vpop.f32.mrb[9].mxu1  ;;  %v3594_v58 = vadd.f32 %v2591_v13, %v2525_v45  ;;  %v1040_v57 = vpop.f32.mrb[9].mxu0  ;;  %v1832_v45 = vld [vmem:[%s3895_s5 + $0x1c8] sm:$0xff]  ;;  %v1831_v13 = vld [vmem:[%s3895_s5 + $0x1c0] sm:$0xff] }
  0xef   :  { %v2526_v37 = vpop.f32.mrb[10].mxu1  ;;  %v3596_v38 = vadd.f32 %v1040_v57, %v488_v14  ;;  %v2592_v62 = vpop.f32.mrb[10].mxu0 }
  0xf0   :  { %v3598_v1 = vpop.permute.xlu1 %1604  ;;  %v3600_v2 = vadd.f32 %v2592_v62, %v2526_v37  ;;  %v3602_v49 = vpop.permute.xlu0 %1599 }
  0xf1   :  { %3923 = vst [vmem:[#allocation31_spill] sm:$0xff] %v3598_v1  ;;  %3924 = vst [vmem:[#allocation32_spill] sm:$0xff] %v3602_v49  ;;  %v491_v50 = vpop.f32.mrb[11].mxu1  ;;  %2116 = vperm.xlu1 %2713, %v1830_v46   ;;  %2111 = vperm.xlu0 %2712, %v1829_v29   ;;  %v1043_v41 = vpop.f32.mrb[11].mxu0  ;;  %v1834_v1 = vld [vmem:[%s3895_s5 + $0x1d8] sm:$0xff]  ;;  %v1833_v49 = vld [vmem:[%s3895_s5 + $0x1d0] sm:$0xff] }
  0xf2   :  { %v3610_v14 = vadd.f32 %v1043_v41, %v491_v50 }
  0xf4   :  { %v3612_v57 = vpop.permute.xlu1 %1614  ;;  %v3614_v62 = vpop.permute.xlu0 %1609 }
  0xf5   :  { %3925 = vst [vmem:[#allocation33_spill] sm:$0xff] %v3612_v57  ;;  %3926 = vst [vmem:[#allocation34_spill] sm:$0xff] %v3614_v62  ;;  %2126 = vperm.xlu1 %2713, %v1832_v45   ;;  %2121 = vperm.xlu0 %2712, %v1831_v13   ;;  %v2529_v37 = vpop.f32.mrb[12].mxu1  ;;  %v2595_v46 = vpop.f32.mrb[12].mxu0 }
  0xf6   :  { %v504_v29 = vpop.f32.mrb[13].mxu1  ;;  %v3622_v42 = vadd.f32 %v2595_v46, %v2529_v37  ;;  %v1056_v41 = vpop.f32.mrb[13].mxu0  ;;  %v1836_v37 = vld [vmem:[%s3895_s5 + $0x1e8] sm:$0xff]  ;;  %v1835_v46 = vld [vmem:[%s3895_s5 + $0x1e0] sm:$0xff] }
  0xf7   :  { %v2530_v50 = vpop.f32.mrb[14].mxu1  ;;  %v3624_v57 = vadd.f32 %v1056_v41, %v504_v29  ;;  %v2596_v62 = vpop.f32.mrb[14].mxu0 }
  0xf8   :  { %v3626_v45 = vpop.permute.xlu1 %1624  ;;  %v3628_v13 = vadd.f32 %v2596_v62, %v2530_v50  ;;  %v3630_v33 = vpop.permute.xlu0 %1619 }
  0xf9   :  { %3927 = vst [vmem:[#allocation35_spill] sm:$0xff] %v3626_v45  ;;  %3928 = vst [vmem:[#allocation36_spill] sm:$0xff] %v3630_v33  ;;  %v507_v34 = vpop.f32.mrb[15].mxu1  ;;  %2136 = vperm.xlu1 %2713, %v1834_v1   ;;  %2131 = vperm.xlu0 %2712, %v1833_v49   ;;  %v1059_v25 = vpop.f32.mrb[15].mxu0  ;;  %v1838_v45 = vld [vmem:[%s3895_s5 + $0x1f8] sm:$0xff]  ;;  %v1837_v33 = vld [vmem:[%s3895_s5 + $0x1f0] sm:$0xff] }
  0xfa   :  { %v3638_v29 = vadd.f32 %v1059_v25, %v507_v34  ;;  %v1648_v25 = vadd.f32 %v3320_v12, %v3554_v54  ;;  %v2292_v54 = vld [vmem:[#allocation2] sm:$0x1]  ;;  %s2804_s5 = smov [#allocation3]  }
  0xfb   :  { %s2310_s11 = sshll.u32 %s2804_s5, 4  ;;  %s2311_s11 = int_to_ptr.vmem [resolvable:$true] %s2310_s11 }
  0xfc   :  { %v3640_v41 = vpop.permute.xlu1 %1634  ;;  %v3642_v62 = vpop.permute.xlu0 %1629  ;;  %s2779_s12 = scalar_lea.vmem %s2311_s11, 16  ;;  %s2783_s13 = scalar_lea.vmem %s2311_s11, 32 }
  0xfd   :  { %3929 = vst [vmem:[#allocation37_spill] sm:$0xff] %v3640_v41  ;;  %3930 = vst [vmem:[#allocation38_spill] sm:$0xff] %v3642_v62  ;;  %2146 = vperm.xlu1 %2713, %v1836_v37   ;;  %2141 = vperm.xlu0 %2712, %v1835_v46   ;;  %v2533_v50 = vpop.f32.mrb[16].mxu1  ;;  %v2599_v1 = vpop.f32.mrb[16].mxu0  ;;  %v1647_v37 = vadd.f32 %v3310_v8, %v3540_v21  ;;  %v1649_v8 = vadd.f32 %v3308_v7, %v3538_v6  ;;  %p2780_p0 = scmp.ne.s32.totalorder %s2311_s11, %s2779_s12  ;;  %p2784_p1 = scmp.lt.s32.totalorder %s2311_s11, %s2311_s11 }
  0xfe   :  { %v520_v49 = vpop.f32.mrb[17].mxu1  ;;  %v3652_v34 = vadd.f32 %v2599_v1, %v2533_v50  ;;  %v1072_v41 = vpop.f32.mrb[17].mxu0  ;;  %v1712_v1 = vmax.f32 %v1648_v25, 0.0  ;;  %v1651_v25 = vadd.f32 %v3330_v16, %v3568_v61  ;;  %p2785_p2 = scmp.lt.s32.totalorder %s2783_s13, %s2779_s12 }
  0xff   :  { %v2534_v62 = vpop.f32.mrb[18].mxu1  ;;  %v3656_v46 = vadd.f32 %v1072_v41, %v520_v49  ;;  %v2600_v26 = vpop.f32.mrb[18].mxu0  ;;  %v1711_v41 = vmax.f32 %v1647_v37, 0.0 }
 0x100   :  { %v3658_v17 = vpop.permute.xlu1 %1644  ;;  %v3660_v18 = vadd.f32 %v2600_v26, %v2534_v62  ;;  %v3662_v9 = vpop.permute.xlu0 %1639  ;;  %v1650_v62 = vadd.f32 %v3318_v11, %v3544_v30  ;;  %p2786_p3 = por %p2785_p2, %p2784_p1 }
 0x101   :  { %3931 = vst [vmem:[#allocation39_spill] sm:$0xff] %v3658_v17  ;;  %3932 = vst [vmem:[#allocation40_spill] sm:$0xff] %v3662_v9  ;;  %v523_v10 = vpop.f32.mrb[19].mxu1  ;;  %2156 = vperm.xlu1 %2713, %v1838_v45   ;;  %2151 = vperm.xlu0 %2712, %v1837_v33   ;;  %v1075_v12 = vpop.f32.mrb[19].mxu0 }
 0x102   :  { %v3664_v50 = vadd.f32 %v1075_v12, %v523_v10  ;;  %v1714_v30 = vmax.f32 %v1650_v62, 0.0  ;;  %p2787_p4 = pnand %p2786_p3, %p2780_p0 }
 0x104   :  { %v1847_v21 = vpop.permute.xlu1 %1846  ;;  %v1842_v3 = vpop.permute.xlu0 %1841 }
 0x105   :  { %v2160_v49 = vmul.f32 %v1847_v21, %v1712_v1  ;;  %2295 = vperm.xlu0 %2712, %v2292_v54   ;;  %v2537_v26 = vpop.f32.mrb[20].mxu1  ;;  %v2159_v17 = vmul.f32 %v1842_v3, %v1711_v41  ;;  %v2603_v45 = vpop.f32.mrb[20].mxu0  ;;  %v1713_v54 = vmax.f32 %v1649_v8, 0.0  ;;  %v1652_v3 = vadd.f32 %v3328_v15, %v3582_v5 }
 0x106   :  { %v536_v33 = vpop.f32.mrb[21].mxu1  ;;  %v3670_v9 = vadd.f32 %v2603_v45, %v2537_v26  ;;  %v1088_v10 = vpop.f32.mrb[21].mxu0  ;;  %v1653_v45 = vadd.f32 %v3340_v20, %v3566_v22 }
 0x107   :  { %v2538_v12 = vpop.f32.mrb[22].mxu1  ;;  %v2223_v7 = vadd.f32 %v2160_v49, %v2159_v17  ;;  %v3674_v6 = vadd.f32 %v1088_v10, %v536_v33  ;;  %v2604_v37 = vpop.f32.mrb[22].mxu0  ;;  %v1715_v33 = vmax.f32 %v1651_v25, 0.0  ;;  %v1716_v63 = vmax.f32 %v1652_v3, 0.0 }
 0x108   :  { %v1857_v1 = vpop.permute.xlu1 %1856  ;;  %v3676_v21 = vadd.f32 %v2604_v37, %v2538_v12  ;;  %v1852_v4 = vpop.permute.xlu0 %1851  ;;  %v1654_v12 = vadd.f32 %v3338_v19, %v3572_v53  ;;  %v1717_v22 = vmax.f32 %v1653_v45, 0.0 }
 0x109   :  { %v539_v11 = vpop.f32.mrb[23].mxu1  ;;  %v2161_v41 = vmul.f32 %v1852_v4, %v1713_v54  ;;  %v1091_v26 = vpop.f32.mrb[23].mxu0  ;;  %v2162_v17 = vmul.f32 %v1857_v1, %v1714_v30 }
 0x10a   :  { %v3682_v16 = vadd.f32 %v1091_v26, %v539_v11  ;;  %v1656_v26 = vadd.f32 %v3348_v23, %v3610_v14 }
 0x10b   :  { %v2224_v61 = vadd.f32 %v2223_v7, %v2161_v41  ;;  %v1655_v7 = vadd.f32 %v3350_v24, %v3596_v38  ;;  %v1657_v24 = vadd.f32 %v3360_v28, %v3594_v58 }
 0x10c   :  { %v1867_v49 = vpop.permute.xlu1 %1866  ;;  %v1862_v8 = vpop.permute.xlu0 %1861 }
 0x10d   :  { %v2541_v10 = vpop.f32.mrb[24].mxu1  ;;  %v2225_v37 = vadd.f32 %v2224_v61, %v2162_v17  ;;  %v2163_v15 = vmul.f32 %v1862_v8, %v1715_v33  ;;  %v2607_v5 = vpop.f32.mrb[24].mxu0  ;;  %v2164_v1 = vmul.f32 %v1867_v49, %v1716_v63  ;;  %v1718_v17 = vmax.f32 %v1654_v12, 0.0 }
 0x10e   :  { %v552_v4 = vpop.f32.mrb[25].mxu1  ;;  %v3686_v62 = vadd.f32 %v2607_v5, %v2541_v10  ;;  %v1104_v54 = vpop.f32.mrb[25].mxu0  ;;  %v1719_v10 = vmax.f32 %v1655_v7, 0.0  ;;  %v1658_v5 = vadd.f32 %v3358_v27, %v3600_v2  ;;  %v1721_v58 = vmax.f32 %v1657_v24, 0.0 }
 0x10f   :  { %v2542_v20 = vpop.f32.mrb[26].mxu1  ;;  %v2226_v25 = vadd.f32 %v2225_v37, %v2163_v15  ;;  %v3690_v11 = vadd.f32 %v1104_v54, %v552_v4  ;;  %v2608_v30 = vpop.f32.mrb[26].mxu0  ;;  %v1720_v4 = vmax.f32 %v1656_v26, 0.0  ;;  %v1660_v26 = vadd.f32 %v3368_v31, %v3638_v29 }
 0x110   :  { %v1877_v41 = vpop.permute.xlu1 %1876  ;;  %v3692_v19 = vadd.f32 %v2608_v30, %v2542_v20  ;;  %v1872_v53 = vpop.permute.xlu0 %1871 }
 0x111   :  { %v555_v3 = vpop.f32.mrb[27].mxu1  ;;  %v2165_v61 = vmul.f32 %v1872_v53, %v1717_v22  ;;  %v2227_v33 = vadd.f32 %v2226_v25, %v2164_v1  ;;  %v1107_v45 = vpop.f32.mrb[27].mxu0  ;;  %v2166_v38 = vmul.f32 %v1877_v41, %v1718_v17  ;;  %v1659_v1 = vadd.f32 %v3370_v32, %v3624_v57 }
 0x112   :  { %v3698_v63 = vadd.f32 %v1107_v45, %v555_v3  ;;  %v1722_v17 = vmax.f32 %v1658_v5, 0.0  ;;  %v1661_v32 = vadd.f32 %v3380_v36, %v3622_v42 }
 0x113   :  { %v2228_v49 = vadd.f32 %v2227_v33, %v2165_v61 }
 0x114   :  { %v1887_v8 = vpop.permute.xlu1 %1886  ;;  %v1882_v37 = vpop.permute.xlu0 %1881  ;;  %v1725_v42 = vmax.f32 %v1661_v32, 0.0 }
 0x115   :  { %v2545_v15 = vpop.f32.mrb[28].mxu1  ;;  %v2167_v23 = vmul.f32 %v1882_v37, %v1719_v10  ;;  %v2229_v14 = vadd.f32 %v2228_v49, %v2166_v38  ;;  %v2611_v12 = vpop.f32.mrb[28].mxu0  ;;  %v2168_v25 = vmul.f32 %v1887_v8, %v1720_v4  ;;  %v1723_v8 = vmax.f32 %v1659_v1, 0.0 }
 0x116   :  { %v568_v54 = vpop.f32.mrb[29].mxu1  ;;  %v3702_v20 = vadd.f32 %v2611_v12, %v2545_v15  ;;  %v1120_v22 = vpop.f32.mrb[29].mxu0  ;;  %v1662_v15 = vadd.f32 %v3378_v35, %v3628_v13  ;;  %v1724_v4 = vmax.f32 %v1660_v26, 0.0 }
 0x117   :  { %v2546_v28 = vpop.f32.mrb[30].mxu1  ;;  %v2230_v7 = vadd.f32 %v2229_v14, %v2167_v23  ;;  %v3706_v30 = vadd.f32 %v1120_v22, %v568_v54  ;;  %v2612_v41 = vpop.f32.mrb[30].mxu0  ;;  %v1663_v54 = vadd.f32 %v3390_v40, %v3656_v46  ;;  %v1665_v40 = vadd.f32 %v3400_v44, %v3652_v34 }
 0x118   :  { %v1897_v53 = vpop.permute.xlu1 %1896  ;;  %v3708_v27 = vadd.f32 %v2612_v41, %v2546_v28  ;;  %v1892_v2 = vpop.permute.xlu0 %1891  ;;  %v1664_v41 = vadd.f32 %v3388_v39, %v3664_v50 }
 0x119   :  { %v571_v3 = vpop.f32.mrb[31].mxu1  ;;  %v2169_v61 = vmul.f32 %v1892_v2, %v1721_v58  ;;  %v2231_v33 = vadd.f32 %v2230_v7, %v2168_v25  ;;  %v1123_v45 = vpop.f32.mrb[31].mxu0  ;;  %v2170_v24 = vmul.f32 %v1897_v53, %v1722_v17  ;;  %v1726_v53 = vmax.f32 %v1662_v15, 0.0 }
 0x11a   :  { %v3714_v57 = vadd.f32 %v1123_v45, %v571_v3  ;;  %v1727_v45 = vmax.f32 %v1663_v54, 0.0  ;;  %v1729_v34 = vmax.f32 %v1665_v40, 0.0 }
 0x11b   :  { %v2232_v38 = vadd.f32 %v2231_v33, %v2169_v61 }
 0x11c   :  { %v1907_v49 = vpop.permute.xlu1 %1906  ;;  %v1902_v10 = vpop.permute.xlu0 %1901 }
 0x11d   :  { %v2549_v37 = vpop.f32.mrb[32].mxu1  ;;  %v2171_v31 = vmul.f32 %v1902_v10, %v1723_v8  ;;  %v2233_v29 = vadd.f32 %v2232_v38, %v2170_v24  ;;  %v2615_v5 = vpop.f32.mrb[32].mxu0  ;;  %v2172_v22 = vmul.f32 %v1907_v49, %v1724_v4  ;;  %v1666_v38 = vadd.f32 %v3398_v43, %v3660_v18 }
 0x11e   :  { %v584_v23 = vpop.f32.mrb[33].mxu1  ;;  %v3718_v14 = vadd.f32 %v2615_v5, %v2549_v37  ;;  %v1136_v12 = vpop.f32.mrb[33].mxu0  ;;  %v1728_v49 = vmax.f32 %v1664_v41, 0.0  ;;  %v1667_v4 = vadd.f32 %v3410_v48, %v3674_v6  ;;  %v1669_v48 = vadd.f32 %v3420_v52, %v3670_v9 }
 0x11f   :  { %v2550_v36 = vpop.f32.mrb[34].mxu1  ;;  %v2234_v28 = vadd.f32 %v2233_v29, %v2171_v31  ;;  %v3722_v58 = vadd.f32 %v1136_v12, %v584_v23  ;;  %v2616_v1 = vpop.f32.mrb[34].mxu0  ;;  %v1730_v54 = vmax.f32 %v1666_v38, 0.0 }
 0x120   :  { %v1917_v25 = vpop.permute.xlu1 %1916  ;;  %v3724_v35 = vadd.f32 %v2616_v1, %v2550_v36  ;;  %v1912_v13 = vpop.permute.xlu0 %1911  ;;  %v1731_v41 = vmax.f32 %v1667_v4, 0.0  ;;  %v1733_v9 = vmax.f32 %v1669_v48, 0.0  ;;  %v1675_v48 = vadd.f32 %v3450_v0, %v3706_v30 }
 0x121   :  { %v587_v7 = vpop.f32.mrb[35].mxu1  ;;  %v2173_v2 = vmul.f32 %v1912_v13, %v1725_v42  ;;  %v2235_v3 = vadd.f32 %v2234_v28, %v2172_v22  ;;  %v1139_v26 = vpop.f32.mrb[35].mxu0  ;;  %v2174_v17 = vmul.f32 %v1917_v25, %v1726_v53  ;;  %v1668_v42 = vadd.f32 %v3408_v47, %v3682_v16 }
 0x122   :  { %v3730_v46 = vadd.f32 %v1139_v26, %v587_v7 }
 0x123   :  { %v2236_v61 = vadd.f32 %v2235_v3, %v2173_v2  ;;  %v1670_v3 = vadd.f32 %v3418_v51, %v3676_v21  ;;  %v1732_v26 = vmax.f32 %v1668_v42, 0.0 }
 0x124   :  { %v1927_v33 = vpop.permute.xlu1 %1926  ;;  %v1922_v32 = vpop.permute.xlu0 %1921 }
 0x125   :  { %v2553_v24 = vpop.f32.mrb[36].mxu1  ;;  %v2175_v39 = vmul.f32 %v1922_v32, %v1727_v45  ;;  %v2237_v50 = vadd.f32 %v2236_v61, %v2174_v17  ;;  %v2619_v8 = vpop.f32.mrb[36].mxu0  ;;  %v2176_v31 = vmul.f32 %v1927_v33, %v1728_v49  ;;  %v1671_v45 = vadd.f32 %v3430_v56, %v3690_v11 }
 0x126   :  { %v600_v10 = vpop.f32.mrb[37].mxu1  ;;  %v3734_v37 = vadd.f32 %v2619_v8, %v2553_v24  ;;  %v1152_v15 = vpop.f32.mrb[37].mxu0  ;;  %v1672_v8 = vadd.f32 %v3428_v55, %v3698_v63  ;;  %v1673_v56 = vadd.f32 %v3440_v60, %v3686_v62 }
 0x127   :  { %v2554_v44 = vpop.f32.mrb[38].mxu1  ;;  %v2238_v29 = vadd.f32 %v2237_v50, %v2175_v39  ;;  %v3738_v5 = vadd.f32 %v1152_v15, %v600_v10  ;;  %v2620_v23 = vpop.f32.mrb[38].mxu0  ;;  %v1734_v10 = vmax.f32 %v1670_v3, 0.0  ;;  %v3933_v3 = vld [vmem:[#allocation6_spill] sm:$0xff] }
 0x128   :  { %v1937_v12 = vpop.permute.xlu1 %1936  ;;  %v3740_v43 = vadd.f32 %v2620_v23, %v2554_v44  ;;  %v1932_v18 = vpop.permute.xlu0 %1931  ;;  %v1735_v23 = vmax.f32 %v1671_v45, 0.0  ;;  %v1736_v42 = vmax.f32 %v1672_v8, 0.0  ;;  %v1737_v62 = vmax.f32 %v1673_v56, 0.0 }
 0x129   :  { %v603_v36 = vpop.f32.mrb[39].mxu1  ;;  %v2177_v22 = vmul.f32 %v1932_v18, %v1729_v34  ;;  %v2239_v28 = vadd.f32 %v2238_v29, %v2176_v31  ;;  %v1155_v1 = vpop.f32.mrb[39].mxu0  ;;  %v2178_v25 = vmul.f32 %v1937_v12, %v1730_v54 }
 0x12a   :  { %v3746_v6 = vadd.f32 %v1155_v1, %v603_v36  ;;  %v1674_v36 = vadd.f32 %v3438_v59, %v3692_v19 }
 0x12b   :  { %v2240_v13 = vadd.f32 %v2239_v28, %v2177_v22 }
 0x12c   :  { %v1947_v7 = vpop.permute.xlu1 %1946  ;;  %v1942_v53 = vpop.permute.xlu0 %1941 }
 0x12d   :  { %v2557_v2 = vpop.f32.mrb[40].mxu1  ;;  %v2179_v47 = vmul.f32 %v1942_v53, %v1731_v41  ;;  %v2241_v16 = vadd.f32 %v2240_v13, %v2178_v25  ;;  %v2623_v40 = vpop.f32.mrb[40].mxu0  ;;  %v2180_v32 = vmul.f32 %v1947_v7, %v1732_v26  ;;  %v1676_v26 = vadd.f32 %v3933_v3, %v3714_v57 }
 0x12e   :  { %v616_v17 = vpop.f32.mrb[41].mxu1  ;;  %v3750_v61 = vadd.f32 %v2623_v40, %v2557_v2  ;;  %v1168_v33 = vpop.f32.mrb[41].mxu0 }
 0x12f   :  { %v2558_v52 = vpop.f32.mrb[42].mxu1  ;;  %v2242_v24 = vadd.f32 %v2241_v16, %v2179_v47  ;;  %v3754_v38 = vadd.f32 %v1168_v33, %v616_v17  ;;  %v2624_v49 = vpop.f32.mrb[42].mxu0  ;;  %v1738_v47 = vmax.f32 %v1674_v36, 0.0  ;;  %v3934_v33 = vld [vmem:[#allocation8_spill] sm:$0xff] }
 0x130   :  { %v1957_v39 = vpop.permute.xlu1 %1956  ;;  %v3756_v51 = vadd.f32 %v2624_v49, %v2558_v52  ;;  %v1952_v21 = vpop.permute.xlu0 %1951  ;;  %v1677_v0 = vadd.f32 %v3934_v33, %v3702_v20 }
 0x131   :  { %v619_v50 = vpop.f32.mrb[43].mxu1  ;;  %v2181_v15 = vmul.f32 %v1952_v21, %v1733_v9  ;;  %v2243_v44 = vadd.f32 %v2242_v24, %v2180_v32  ;;  %v1171_v34 = vpop.f32.mrb[43].mxu0  ;;  %v2182_v4 = vmul.f32 %v1957_v39, %v1734_v10  ;;  %v1739_v32 = vmax.f32 %v1675_v48, 0.0  ;;  %v3935_v39 = vld [vmem:[#allocation7_spill] sm:$0xff]  ;;  %v3938_v48 = vld [vmem:[#allocation12_spill] sm:$0xff] }
 0x132   :  { %v3762_v11 = vadd.f32 %v1171_v34, %v619_v50  ;;  %v1678_v21 = vadd.f32 %v3935_v39, %v3708_v27  ;;  %v1740_v50 = vmax.f32 %v1676_v26, 0.0  ;;  %v1741_v56 = vmax.f32 %v1677_v0, 0.0  ;;  %v3939_v26 = vld [vmem:[#allocation11_spill] sm:$0xff] }
 0x133   :  { %v2244_v31 = vadd.f32 %v2243_v44, %v2181_v15 }
 0x134   :  { %v1967_v29 = vpop.permute.xlu1 %1966  ;;  %v1962_v12 = vpop.permute.xlu0 %1961 }
 0x135   :  { %v2561_v18 = vpop.f32.mrb[44].mxu1  ;;  %v2183_v55 = vmul.f32 %v1962_v12, %v1735_v23  ;;  %v2245_v63 = vadd.f32 %v2244_v31, %v2182_v4  ;;  %v2627_v54 = vpop.f32.mrb[44].mxu0  ;;  %v2184_v25 = vmul.f32 %v1967_v29, %v1736_v42  ;;  %v3936_v4 = vld [vmem:[#allocation10_spill] sm:$0xff] }
 0x136   :  { %v632_v22 = vpop.f32.mrb[45].mxu1  ;;  %v3766_v28 = vadd.f32 %v2627_v54, %v2561_v18  ;;  %v1184_v1 = vpop.f32.mrb[45].mxu0  ;;  %v1679_v31 = vadd.f32 %v3936_v4, %v3722_v58  ;;  %v1681_v58 = vadd.f32 %v3938_v48, %v3718_v14 }
 0x137   :  { %v2562_v60 = vpop.f32.mrb[46].mxu1  ;;  %v2246_v13 = vadd.f32 %v2245_v63, %v2183_v55  ;;  %v3770_v7 = vadd.f32 %v1184_v1, %v632_v22  ;;  %v2628_v41 = vpop.f32.mrb[46].mxu0  ;;  %v3937_v63 = vld [vmem:[#allocation9_spill] sm:$0xff]  ;;  %v1742_v22 = vmax.f32 %v1678_v21, 0.0 }
 0x138   :  { %v1977_v53 = vpop.permute.xlu1 %1976  ;;  %v3772_v59 = vadd.f32 %v2628_v41, %v2562_v60  ;;  %v1972_v19 = vpop.permute.xlu0 %1971  ;;  %v1680_v54 = vadd.f32 %v3937_v63, %v3730_v46 }
 0x139   :  { %v635_v2 = vpop.f32.mrb[47].mxu1  ;;  %v2185_v16 = vmul.f32 %v1972_v19, %v1737_v62  ;;  %v2247_v40 = vadd.f32 %v2246_v13, %v2184_v25  ;;  %v1187_v17 = vpop.f32.mrb[47].mxu0  ;;  %v2186_v52 = vmul.f32 %v1977_v53, %v1738_v47  ;;  %v1743_v19 = vmax.f32 %v1679_v31, 0.0  ;;  %v3942_v31 = vld [vmem:[#allocation16_spill] sm:$0xff] }
 0x13a   :  { %v3778_v30 = vadd.f32 %v1187_v17, %v635_v2  ;;  %v1682_v47 = vadd.f32 %v3939_v26, %v3724_v35 }
 0x13b   :  { %v2248_v9 = vadd.f32 %v2247_v40, %v2185_v16  ;;  %v1744_v16 = vmax.f32 %v1680_v54, 0.0  ;;  %v3943_v54 = vld [vmem:[#allocation15_spill] sm:$0xff] }
 0x13c   :  { %v1987_v45 = vpop.permute.xlu1 %1986  ;;  %v1982_v24 = vpop.permute.xlu0 %1981 }
 0x13d   :  { %v2565_v49 = vpop.f32.mrb[48].mxu1  ;;  %v2187_v57 = vmul.f32 %v1982_v24, %v1739_v32  ;;  %v2249_v8 = vadd.f32 %v2248_v9, %v2186_v52  ;;  %v2188_v29 = vmul.f32 %v1987_v45, %v1740_v50  ;;  %v1745_v9 = vmax.f32 %v1681_v58, 0.0  ;;  %v3940_v45 = vld [vmem:[#allocation14_spill] sm:$0xff] }
 0x13e   :  { %v2631_v10 = vpop.f32.mrb[48].mxu0  ;;  %v648_v15 = vpop.f32.mrb[49].mxu1  ;;  %v1683_v32 = vadd.f32 %v3940_v45, %v3738_v5  ;;  %v1685_v5 = vadd.f32 %v3942_v31, %v3734_v37 }
 0x13f   :  { %v3782_v44 = vadd.f32 %v2631_v10, %v2565_v49  ;;  %v1200_v34 = vpop.f32.mrb[49].mxu0  ;;  %v2566_v20 = vpop.f32.mrb[50].mxu1  ;;  %v2250_v23 = vadd.f32 %v2249_v8, %v2187_v57  ;;  %v3941_v10 = vld [vmem:[#allocation13_spill] sm:$0xff] }
 0x140   :  { %v3786_v12 = vadd.f32 %v1200_v34, %v648_v15  ;;  %v2632_v18 = vpop.f32.mrb[50].mxu0  ;;  %v1997_v36 = vpop.permute.xlu1 %1996  ;;  %v1684_v15 = vadd.f32 %v3941_v10, %v3746_v6  ;;  %v1746_v34 = vmax.f32 %v1682_v47, 0.0 }
 0x141   :  { %v3788_v27 = vadd.f32 %v2632_v18, %v2566_v20  ;;  %v1992_v42 = vpop.permute.xlu0 %1991  ;;  %v651_v55 = vpop.f32.mrb[51].mxu1  ;;  %v2251_v60 = vadd.f32 %v2250_v23, %v2188_v29  ;;  %v2190_v13 = vmul.f32 %v1997_v36, %v1742_v22  ;;  %v1686_v22 = vadd.f32 %v3943_v54, %v3740_v43 }
 0x142   :  { %v2189_v1 = vmul.f32 %v1992_v42, %v1741_v56  ;;  %v1203_v62 = vpop.f32.mrb[51].mxu0  ;;  %v1747_v42 = vmax.f32 %v1683_v32, 0.0  ;;  %v3946_v32 = vld [vmem:[#allocation20_spill] sm:$0xff] }
 0x143   :  { %v3794_v25 = vadd.f32 %v1203_v62, %v651_v55 }
 0x144   :  { %v2252_v41 = vadd.f32 %v2251_v60, %v2189_v1  ;;  %v2007_v53 = vpop.permute.xlu1 %2006  ;;  %v1748_v1 = vmax.f32 %v1684_v15, 0.0  ;;  %v3947_v15 = vld [vmem:[#allocation19_spill] sm:$0xff] }
 0x145   :  { %v2002_v2 = vpop.permute.xlu0 %2001  ;;  %v2569_v3 = vpop.f32.mrb[52].mxu1  ;;  %v2192_v24 = vmul.f32 %v2007_v53, %v1744_v16  ;;  %v3944_v53 = vld [vmem:[#allocation18_spill] sm:$0xff] }
 0x146   :  { %v2191_v46 = vmul.f32 %v2002_v2, %v1743_v19  ;;  %v2253_v40 = vadd.f32 %v2252_v41, %v2190_v13  ;;  %v2635_v17 = vpop.f32.mrb[52].mxu0  ;;  %v664_v33 = vpop.f32.mrb[53].mxu1  ;;  %v1749_v41 = vmax.f32 %v1685_v5, 0.0  ;;  %v1687_v19 = vadd.f32 %v3944_v53, %v3754_v38 }
 0x147   :  { %v3798_v0 = vadd.f32 %v2635_v17, %v2569_v3  ;;  %v1216_v52 = vpop.f32.mrb[53].mxu0  ;;  %v2570_v14 = vpop.f32.mrb[54].mxu1  ;;  %v3945_v17 = vld [vmem:[#allocation17_spill] sm:$0xff]  ;;  %v1689_v38 = vadd.f32 %v3946_v32, %v3750_v61 }
 0x148   :  { %v2254_v49 = vadd.f32 %v2253_v40, %v2191_v46  ;;  %v3802_v39 = vadd.f32 %v1216_v52, %v664_v33  ;;  %v2636_v21 = vpop.f32.mrb[54].mxu0  ;;  %v2017_v50 = vpop.permute.xlu1 %2016  ;;  %v1688_v33 = vadd.f32 %v3945_v17, %v3762_v11  ;;  %v1750_v52 = vmax.f32 %v1686_v22, 0.0  ;;  %v3951_v17 = vld [vmem:[#allocation23_spill] sm:$0xff] }
 0x149   :  { %v3804_v35 = vadd.f32 %v2636_v21, %v2570_v14  ;;  %v2012_v57 = vpop.permute.xlu0 %2011  ;;  %v667_v8 = vpop.f32.mrb[55].mxu1  ;;  %v2194_v23 = vmul.f32 %v2017_v50, %v1746_v34  ;;  %v1690_v34 = vadd.f32 %v3947_v15, %v3756_v51 }
 0x14a   :  { %v2193_v20 = vmul.f32 %v2012_v57, %v1745_v9  ;;  %v2255_v56 = vadd.f32 %v2254_v49, %v2192_v24  ;;  %v1219_v4 = vpop.f32.mrb[55].mxu0  ;;  %v1751_v57 = vmax.f32 %v1687_v19, 0.0 }
 0x14b   :  { %v3810_v29 = vadd.f32 %v1219_v4, %v667_v8 }
 0x14c   :  { %v2256_v18 = vadd.f32 %v2255_v56, %v2193_v20  ;;  %v2027_v36 = vpop.permute.xlu1 %2026  ;;  %v1752_v20 = vmax.f32 %v1688_v33, 0.0  ;;  %v1694_v33 = vadd.f32 %v3951_v17, %v3772_v59  ;;  %v3960_v17 = vld [vmem:[#allocation34_spill] sm:$0xff] }
 0x14d   :  { %v2022_v55 = vpop.permute.xlu0 %2021  ;;  %v2573_v63 = vpop.f32.mrb[56].mxu1  ;;  %v2196_v2 = vmul.f32 %v2027_v36, %v1748_v1  ;;  %v3948_v36 = vld [vmem:[#allocation22_spill] sm:$0xff] }
 0x14e   :  { %v2195_v6 = vmul.f32 %v2022_v55, %v1747_v42  ;;  %v2257_v60 = vadd.f32 %v2256_v18, %v2194_v23  ;;  %v2639_v62 = vpop.f32.mrb[56].mxu0  ;;  %v680_v48 = vpop.f32.mrb[57].mxu1  ;;  %v1753_v18 = vmax.f32 %v1689_v38, 0.0  ;;  %v1691_v42 = vadd.f32 %v3948_v36, %v3770_v7  ;;  %v3950_v7 = vld [vmem:[#allocation24_spill] sm:$0xff] }
 0x14f   :  { %v3814_v58 = vadd.f32 %v2639_v62, %v2573_v63  ;;  %v1232_v13 = vpop.f32.mrb[57].mxu0  ;;  %v2574_v37 = vpop.f32.mrb[58].mxu1  ;;  %v3949_v62 = vld [vmem:[#allocation21_spill] sm:$0xff] }
 0x150   :  { %v2258_v3 = vadd.f32 %v2257_v60, %v2195_v6  ;;  %v3818_v26 = vadd.f32 %v1232_v13, %v680_v48  ;;  %v2640_v47 = vpop.f32.mrb[58].mxu0  ;;  %v2037_v16 = vpop.permute.xlu1 %2036  ;;  %v1692_v48 = vadd.f32 %v3949_v62, %v3778_v30  ;;  %v1754_v13 = vmax.f32 %v1690_v34, 0.0  ;;  %v3954_v34 = vld [vmem:[#allocation28_spill] sm:$0xff] }
 0x151   :  { %v3820_v43 = vadd.f32 %v2640_v47, %v2574_v37  ;;  %v2032_v46 = vpop.permute.xlu0 %2031  ;;  %v683_v40 = vpop.f32.mrb[59].mxu1  ;;  %v2198_v49 = vmul.f32 %v2037_v16, %v1750_v52  ;;  %v1697_v59 = vadd.f32 %v3954_v34, %v3782_v44  ;;  %v3957_v44 = vld [vmem:[#allocation29_spill] sm:$0xff] }
 0x152   :  { %v2197_v14 = vmul.f32 %v2032_v46, %v1749_v41  ;;  %v2259_v9 = vadd.f32 %v2258_v3, %v2196_v2  ;;  %v1235_v45 = vpop.f32.mrb[59].mxu0  ;;  %v1693_v2 = vadd.f32 %v3950_v7, %v3766_v28  ;;  %v1755_v46 = vmax.f32 %v1691_v42, 0.0  ;;  %v3953_v28 = vld [vmem:[#allocation25_spill] sm:$0xff]  ;;  %v3956_v42 = vld [vmem:[#allocation30_spill] sm:$0xff] }
 0x153   :  { %v3826_v24 = vadd.f32 %v1235_v45, %v683_v40  ;;  %v1756_v52 = vmax.f32 %v1692_v48, 0.0 }
 0x154   :  { %v2260_v21 = vadd.f32 %v2259_v9, %v2197_v14  ;;  %v2047_v50 = vpop.permute.xlu1 %2046  ;;  %v3952_v9 = vld [vmem:[#allocation26_spill] sm:$0xff] }
 0x155   :  { %v2042_v8 = vpop.permute.xlu0 %2041  ;;  %v2577_v10 = vpop.f32.mrb[60].mxu1  ;;  %v2200_v55 = vmul.f32 %v2047_v50, %v1752_v20  ;;  %v1695_v45 = vadd.f32 %v3952_v9, %v3786_v12  ;;  %v3955_v12 = vld [vmem:[#allocation27_spill] sm:$0xff] }
 0x156   :  { %v2199_v11 = vmul.f32 %v2042_v8, %v1751_v57  ;;  %v2261_v56 = vadd.f32 %v2260_v21, %v2198_v49  ;;  %v2643_v4 = vpop.f32.mrb[60].mxu0  ;;  %v696_v31 = vpop.f32.mrb[61].mxu1  ;;  %v1757_v21 = vmax.f32 %v1693_v2, 0.0  ;;  %v1696_v57 = vadd.f32 %v3953_v28, %v3794_v25 }
 0x157   :  { %v3830_v5 = vadd.f32 %v2643_v4, %v2577_v10  ;;  %v1248_v23 = vpop.f32.mrb[61].mxu0  ;;  %v2578_v61 = vpop.f32.mrb[62].mxu1  ;;  %v1758_v8 = vmax.f32 %v1694_v33, 0.0  ;;  %v1759_v4 = vmax.f32 %v1695_v45, 0.0  ;;  %v1699_v25 = vadd.f32 %v3956_v42, %v3802_v39  ;;  %v3959_v39 = vld [vmem:[#allocation31_spill] sm:$0xff] }
 0x158   :  { %v2262_v63 = vadd.f32 %v2261_v56, %v2199_v11  ;;  %v3834_v54 = vadd.f32 %v1248_v23, %v696_v31  ;;  %v2644_v22 = vpop.f32.mrb[62].mxu0  ;;  %v2057_v1 = vpop.permute.xlu1 %2056  ;;  %v1698_v23 = vadd.f32 %v3955_v12, %v3788_v27 }
 0x159   :  { %v3836_v51 = vadd.f32 %v2644_v22, %v2578_v61  ;;  %v2052_v6 = vpop.permute.xlu0 %2051  ;;  %v699_v60 = vpop.f32.mrb[63].mxu1  ;;  %v2202_v3 = vmul.f32 %v2057_v1, %v1754_v13  ;;  %v1760_v61 = vmax.f32 %v1696_v57, 0.0  ;;  %v1761_v1 = vmax.f32 %v1697_v59, 0.0 }
 0x15a   :  { %v2201_v37 = vmul.f32 %v2052_v6, %v1753_v18  ;;  %v2263_v41 = vadd.f32 %v2262_v63, %v2200_v55  ;;  %v1251_v53 = vpop.f32.mrb[63].mxu0  ;;  %v1762_v62 = vmax.f32 %v1698_v23, 0.0  ;;  %v1763_v2 = vmax.f32 %v1699_v25, 0.0  ;;  %v3966_v25 = vld [vmem:[#allocation40_spill] sm:$0xff] }
 0x15b   :  { %v3840_v19 = vadd.f32 %v1251_v53, %v699_v60  ;;  %v1700_v60 = vadd.f32 %v3957_v44, %v3810_v29  ;;  %v1703_v29 = vadd.f32 %v3960_v17, %v3818_v26  ;;  %v3963_v26 = vld [vmem:[#allocation35_spill] sm:$0xff] }
 0x15c   :  { %v2264_v47 = vadd.f32 %v2263_v41, %v2201_v37  ;;  %v2067_v16 = vpop.permute.xlu1 %2066  ;;  %v3958_v37 = vld [vmem:[#allocation32_spill] sm:$0xff] }
 0x15d   :  { %v2062_v40 = vpop.permute.xlu0 %2061  ;;  %v2204_v32 = vmul.f32 %v2067_v16, %v1756_v52  ;;  %v1701_v27 = vadd.f32 %v3958_v37, %v3798_v0  ;;  %v1764_v16 = vmax.f32 %v1700_v60, 0.0  ;;  %v3961_v0 = vld [vmem:[#allocation33_spill] sm:$0xff] }
 0x15e   :  { %v2203_v14 = vmul.f32 %v2062_v40, %v1755_v46  ;;  %v2265_v30 = vadd.f32 %v2264_v47, %v2202_v3  ;;  %v1702_v47 = vadd.f32 %v3959_v39, %v3804_v35  ;;  %v1704_v45 = vadd.f32 %v3961_v0, %v3826_v24 }
 0x160   :  { %v2266_v38 = vadd.f32 %v2265_v30, %v2203_v14  ;;  %v2077_v49 = vpop.permute.xlu1 %2076  ;;  %v1765_v30 = vmax.f32 %v1701_v27, 0.0  ;;  %v1768_v34 = vmax.f32 %v1704_v45, 0.0 }
 0x161   :  { %v2072_v50 = vpop.permute.xlu0 %2071  ;;  %v2206_v20 = vmul.f32 %v2077_v49, %v1758_v8  ;;  %v1767_v8 = vmax.f32 %v1703_v29, 0.0 }
 0x162   :  { %v2205_v10 = vmul.f32 %v2072_v50, %v1757_v21  ;;  %v2267_v15 = vadd.f32 %v2266_v38, %v2204_v32  ;;  %v1766_v32 = vmax.f32 %v1702_v47, 0.0  ;;  %v3962_v21 = vld [vmem:[#allocation36_spill] sm:$0xff]  ;;  %v2298_v47 = vlaneseq }
 0x163   :  { %v1705_v35 = vadd.f32 %v3962_v21, %v3814_v58  ;;  %v3965_v58 = vld [vmem:[#allocation37_spill] sm:$0xff] }
 0x164   :  { %v2268_v11 = vadd.f32 %v2267_v15, %v2205_v10  ;;  %v2087_v56 = vpop.permute.xlu1 %2086  ;;  %v1706_v15 = vadd.f32 %v3963_v26, %v3820_v43  ;;  %v1709_v43 = vadd.f32 %v3966_v25, %v3830_v5 }
 0x165   :  { %v2082_v31 = vpop.permute.xlu0 %2081  ;;  %v2208_v55 = vmul.f32 %v2087_v56, %v1760_v61  ;;  %v1769_v12 = vmax.f32 %v1705_v35, 0.0  ;;  %v1708_v61 = vadd.f32 %v3965_v58, %v3840_v19 }
 0x166   :  { %v2207_v18 = vmul.f32 %v2082_v31, %v1759_v4  ;;  %v2269_v36 = vadd.f32 %v2268_v11, %v2206_v20  ;;  %v3964_v11 = vld [vmem:[#allocation38_spill] sm:$0xff]  ;;  %v1773_v19 = vmax.f32 %v1709_v43, 0.0 }
 0x167   :  { %v1707_v24 = vadd.f32 %v3964_v11, %v3834_v54  ;;  %v3967_v54 = vld [vmem:[#allocation39_spill] sm:$0xff]  ;;  %v1772_v60 = vmax.f32 %v1708_v61, 0.0 }
 0x168   :  { %v2270_v63 = vadd.f32 %v2269_v36, %v2207_v18  ;;  %v2097_v22 = vpop.permute.xlu1 %2096  ;;  %v1770_v18 = vmax.f32 %v1706_v15, 0.0  ;;  %v1710_v44 = vadd.f32 %v3967_v54, %v3836_v51 }
 0x169   :  { %v2092_v6 = vpop.permute.xlu0 %2091  ;;  %v2210_v41 = vmul.f32 %v2097_v22, %v1762_v62 }
 0x16a   :  { %v2209_v48 = vmul.f32 %v2092_v6, %v1761_v1  ;;  %v2271_v13 = vadd.f32 %v2270_v63, %v2208_v55  ;;  %v1771_v1 = vmax.f32 %v1707_v24, 0.0 }
 0x16c   :  { %v2272_v53 = vadd.f32 %v2271_v13, %v2209_v48  ;;  %v2107_v7 = vpop.permute.xlu1 %2106 }
 0x16d   :  { %v2102_v3 = vpop.permute.xlu0 %2101  ;;  %v2212_v33 = vmul.f32 %v2107_v7, %v1764_v16 }
 0x16e   :  { %v2211_v46 = vmul.f32 %v2102_v3, %v1763_v2  ;;  %v2273_v40 = vadd.f32 %v2272_v53, %v2210_v41  ;;  %v1774_v53 = vmax.f32 %v1710_v44, 0.0 }
 0x170   :  { %v2274_v52 = vadd.f32 %v2273_v40, %v2211_v46  ;;  %v2117_v14 = vpop.permute.xlu1 %2116  ;;  %v2299_v40 = vshrl.u32 %v2298_v47, 7 }
 0x171   :  { %v2112_v9 = vpop.permute.xlu0 %2111  ;;  %v2214_v50 = vmul.f32 %v2117_v14, %v1766_v32 }
 0x172   :  { %v2213_v38 = vmul.f32 %v2112_v9, %v1765_v30  ;;  %v2275_v49 = vadd.f32 %v2274_v52, %v2212_v33  ;;  %v2300_v51 = vsub.s32 0, %v2299_v40 }
 0x174   :  { %v2276_v28 = vadd.f32 %v2275_v49, %v2213_v38  ;;  %v2127_v57 = vpop.permute.xlu1 %2126 }
 0x175   :  { %v2122_v10 = vpop.permute.xlu0 %2121  ;;  %v2216_v56 = vmul.f32 %v2127_v57, %v1768_v34 }
 0x176   :  { %v2215_v59 = vmul.f32 %v2122_v10, %v1767_v8  ;;  %v2277_v20 = vadd.f32 %v2276_v28, %v2214_v50 }
 0x178   :  { %v2278_v4 = vadd.f32 %v2277_v20, %v2215_v59  ;;  %v2137_v31 = vpop.permute.xlu1 %2136 }
 0x179   :  { %v2132_v23 = vpop.permute.xlu0 %2131  ;;  %v2218_v55 = vmul.f32 %v2137_v31, %v1770_v18 }
 0x17a   :  { %v2217_v36 = vmul.f32 %v2132_v23, %v1769_v12  ;;  %v2279_v42 = vadd.f32 %v2278_v4, %v2216_v56 }
 0x17c   :  { %v2280_v63 = vadd.f32 %v2279_v42, %v2217_v36  ;;  %v2147_v22 = vpop.permute.xlu1 %2146 }
 0x17d   :  { %v2142_v6 = vpop.permute.xlu0 %2141  ;;  %v2220_v13 = vmul.f32 %v2147_v22, %v1772_v60 }
 0x17e   :  { %v2219_v62 = vmul.f32 %v2142_v6, %v1771_v1  ;;  %v2281_v48 = vadd.f32 %v2280_v63, %v2218_v55 }
 0x180   :  { %v2282_v37 = vadd.f32 %v2281_v48, %v2219_v62  ;;  %v2157_v27 = vpop.permute.xlu1 %2156 }
 0x181   :  { %v2152_v41 = vpop.permute.xlu0 %2151  ;;  %v2222_v5 = vmul.f32 %v2157_v27, %v1774_v53 }
 0x182   :  { %v2221_v7 = vmul.f32 %v2152_v41, %v1773_v19  ;;  %v2283_v2 = vadd.f32 %v2282_v37, %v2220_v13 }
 0x184   :  { %v2284_v3 = vadd.f32 %v2283_v2, %v2221_v7 }
 0x185   :  { %v2296_v33 = vpop.permute.xlu0 %2295 }
 0x186   :  { %v2285_v39 = vadd.f32 %v2284_v3, %v2222_v5  ;;  %v2301_v14 = vrot.slane %v2296_v33, %v2300_v51 }
 0x188   :  { %v2286_v16 = vrot.slane %v2285_v39, 4 }
 0x18a   :  { %v2287_v46 = vadd.f32 %v2286_v16, %v2285_v39 }
 0x18c   :  { %v2288_v17 = vrot.slane %v2287_v46, 2 }
 0x18e   :  { %v2289_v29 = vadd.f32 %v2288_v17, %v2287_v46 }
 0x190   :  { %v2290_v52 = vrot.slane %v2289_v29, 1 }
 0x192   :  { %v2291_v30 = vadd.f32 %v2290_v52, %v2289_v29 }
 0x194   :  { %v2302_v9 = vadd.f32 %v2301_v14, %v2291_v30 }
 0x196   :  { %2303 = vst [vmem:[#allocation3] sm:$0x1] %v2302_v9 }
 0x197   :  { %2790 = shalt.err (!%p2787_p4)
}
 0x198   :  { %s2791_s0 = scalar_lea.hbm %s3897_s7, 16 }
 0x199   :  { %p2792_p5 = scmp.ne.s32.totalorder %s3897_s7, %s2791_s0  ;;  %p2795_p6 = scmp.lt.u32.totalorder %s2791_s0, %s3897_s7 }
 0x19b   :  { %p2797_p7 = pnand %p2795_p6, %p2792_p5 }
 0x19d   :  { %2800 = shalt.err (!%p2797_p7)
}
 0x19e   :  { %2313 = dma.vmem_to_hbm [thread:$0]  %s2311_s11, 16, %s3897_s7, [#allocation4]  }
 0x19f   :  { %2801 = dma.done.wait [#allocation4], 16  }
 0x1a0   :  { %2802 = vsyncadd [#allocation4], 4294967280 }
 0x1a1   :  { %2317 = vsyncpa [#allocation4], 1 }

</bundles_post_ra>
